<compile_context>
chip_gen: v7x
topology: tpu7x:2x2x1
jax: 0.10.0
libtpu: 0.0.40
codegen_flags: <defaults>
</compile_context>

<pallas_src>
import jax
import jax.numpy as jnp
from jax.experimental import pallas as pl
from jax.experimental.pallas import tpu as pltpu


def _make_kernel(T, B, H):
    """Build the kernel for static (T, padded B, H)."""

    def kernel(x_ref,                       # (T*B, D)  time-major, batch-padded, flattened
               wih0_ref, whh0_ref, b0_ref,  # (D,4H), (H,4H), (1,4H)   gate order [i,f,o,g]
               w1_ref, b1_ref,              # (2H,4H) = [W_ih1; W_hh1], (1,4H)
               wd0_ref, bd0_ref,            # (H,F0), (1,F0)
               wd1_ref, bd1_ref,            # (F0,F1), (1,F1)
               out_ref):                    # (B, F1)
        # ---- hoist all weight loads out of the recurrence ------------------
        wih0 = wih0_ref[...]
        whh0 = whh0_ref[...]
        b0 = b0_ref[...]
        w1 = w1_ref[...]
        b1 = b1_ref[...]

        # ---- time-parallel layer-0 input projection -------------------------
        # One (T*B, D) x (D, 4H) MXU call instead of T tiny matmuls inside the loop.
        gates0_x = jnp.dot(x_ref[...], wih0,
                           preferred_element_type=jnp.float32) + b0       # (T*B, 4H)

        def gate_act(g):
            # Gates permuted wrapper-side to [i, f, o, g]:
            # one sigmoid over a contiguous 3H slice, one tanh on the trailing H slice.
            sfo = jax.nn.sigmoid(g[:, :3 * H])
            gg = jnp.tanh(g[:, 3 * H:])
            return sfo[:, :H], sfo[:, H:2 * H], sfo[:, 2 * H:3 * H], gg

        h0 = jnp.zeros((B, H), jnp.float32)
        c0 = jnp.zeros((B, H), jnp.float32)
        h1 = jnp.zeros((B, H), jnp.float32)
        c1 = jnp.zeros((B, H), jnp.float32)

        # ---- fully unrolled recurrence (T small and static) ------------------
        # Serial MXU work per step: h0 @ W_hh0 (K=H) and [h0,h1] @ W1 (K=2H).
        for t in range(T):
            # layer 0
            g0 = gates0_x[t * B:(t + 1) * B, :] + jnp.dot(
                h0, whh0, preferred_element_type=jnp.float32)
            i0, f0, o0, gg0 = gate_act(g0)
            c0 = f0 * c0 + i0 * gg0
            h0 = o0 * jnp.tanh(c0)

            # layer 1 (fused input+recurrent matmul)
            hcat = jnp.concatenate([h0, h1], axis=1)                       # (B, 2H)
            g1 = jnp.dot(hcat, w1, preferred_element_type=jnp.float32) + b1
            i1, f1, o1, gg1 = gate_act(g1)
            c1 = f1 * c1 + i1 * gg1
            h1 = o1 * jnp.tanh(c1)

        # ---- dense head ------------------------------------------------------
        # dense[0] -> ReLU  (dropout is identity in eval mode)
        # TODO(synk): nn.Dropout is a no-op at inference; not modeled as random masking here.
        y = jnp.dot(h1, wd0_ref[...], preferred_element_type=jnp.float32) + bd0_ref[...]
        y = jnp.maximum(y, 0.0)

        # dense[-1] -> last_layer_activation ('Sigmoid()')
        z = jnp.dot(y, wd1_ref[...], preferred_element_type=jnp.float32) + bd1_ref[...]
        out_ref[...] = jax.nn.sigmoid(z)

    return kernel


def simple_lstm_forward(x, params):
    """x: (B, T, D) batch_first, float32.  Returns (B, linear_features[-1])."""
    B, T, D = x.shape
    H = params['whh0'].shape[0]
    F_out = params['wd1'].shape[1]

    # ---- one-time wrapper-side layout prep ---------------------------------
    # Gate permutation [i, f, g, o] -> [i, f, o, g] along the 4H axis.
    perm = jnp.concatenate([jnp.arange(0, H), jnp.arange(H, 2 * H),
                            jnp.arange(3 * H, 4 * H), jnp.arange(2 * H, 3 * H)])
    wih0 = params['wih0'][:, perm]
    whh0 = params['whh0'][:, perm]
    b0 = params['b0'][:, perm]
    # Layer-1 fused weight: [h0, h1] @ [W_ih1; W_hh1] == h0 @ W_ih1 + h1 @ W_hh1.
    w1 = jnp.concatenate([params['wih1'], params['whh1']], axis=0)[:, perm]
    b1 = params['b1'][:, perm]

    # Time-major, pad batch up to a full 8-row f32 sublane tile, flatten (T, B) -> T*B.
    B_pad = max(8, -(-B // 8) * 8)
    x_tm = jnp.transpose(x, (1, 0, 2))                    # (T, B, D)
    x_tm = jnp.pad(x_tm, ((0, 0), (0, B_pad - B), (0, 0)))
    x_flat = x_tm.reshape(T * B_pad, D)

    vmem = pl.BlockSpec(memory_space=pltpu.MemorySpace.VMEM)
    out = pl.pallas_call(
        _make_kernel(T, B_pad, H),
        out_shape=jax.ShapeDtypeStruct((B_pad, F_out), jnp.float32),
        in_specs=[vmem] * 10,
        out_specs=vmem,
    )(x_flat, wih0, whh0, b0, w1, b1,
      params['wd0'], params['bd0'], params['wd1'], params['bd1'])
    return out[:B]


def reference_forward(x, params):
    """Pure-JAX reference mirroring PyTorch nn.LSTM(batch_first)+Linear semantics."""
    B, T, _ = x.shape
    H = params['whh0'].shape[0]

    def cell(x_t, h, c, wih, whh, b):
        g = x_t @ wih + h @ whh + b
        i = jax.nn.sigmoid(g[:, :H])
        f = jax.nn.sigmoid(g[:, H:2 * H])
        gg = jnp.tanh(g[:, 2 * H:3 * H])
        o = jax.nn.sigmoid(g[:, 3 * H:])
        c = f * c + i * gg
        return o * jnp.tanh(c), c

    h0 = c0 = h1 = c1 = jnp.zeros((B, H), jnp.float32)
    for t in range(T):
        h0, c0 = cell(x[:, t], h0, c0, params['wih0'], params['whh0'], params['b0'])
        h1, c1 = cell(h0, h1, c1, params['wih1'], params['whh1'], params['b1'])
    y = jnp.maximum(h1 @ params['wd0'] + params['bd0'], 0.0)
    return jax.nn.sigmoid(y @ params['wd1'] + params['bd1'])


def init_params(key, input_size, hidden_size, linear_features):
    """Deterministic synthetic init (uniform +-1/sqrt(H), like PyTorch's default)."""
    k = 1.0 / jnp.sqrt(hidden_size)
    keys = jax.random.split(key, 10)
    u = lambda kk, shape, s: jax.random.uniform(kk, shape, jnp.float32, -s, s)
    H, D = hidden_size, input_size
    F0, F1 = linear_features
    return {
        # LSTM layer 0 (input D -> hidden H), gate order [i, f, g, o], bias = b_ih + b_hh
        'wih0': u(keys[0], (D, 4 * H), k),
        'whh0': u(keys[1], (H, 4 * H), k),
        'b0':   u(keys[2], (1, 4 * H), k),
        # LSTM layer 1 (hidden H -> hidden H)
        'wih1': u(keys[3], (H, 4 * H), k),
        'whh1': u(keys[4], (H, 4 * H), k),
        'b1':   u(keys[5], (1, 4 * H), k),
        # dense[0]: H -> F0
        'wd0':  u(keys[6], (H, F0), 1.0 / jnp.sqrt(H)),
        'bd0':  u(keys[7], (1, F0), 1.0 / jnp.sqrt(H)),
        # dense[1] (last): F0 -> F1
        'wd1':  u(keys[8], (F0, F1), 1.0 / jnp.sqrt(F0)),
        'bd1':  u(keys[9], (1, F1), 1.0 / jnp.sqrt(F0)),
    }


if __name__ == "__main__":
    net_arch = {
        'input_size': 16,
        'hidden_size': 32,
        'num_layers': 2,
        'lstm_dropout': 0.0,
        'linear_features': [16, 4],
        'linear_dropout': [0.1],
        'last_layer_activation': 'Sigmoid()',
    }

    B, T = 2, 8
    key = jax.random.PRNGKey(0)
    k_x, k_p = jax.random.split(key)
    x = jax.random.normal(k_x, (B, T, net_arch['input_size']), jnp.float32)
    params = init_params(k_p, net_arch['input_size'], net_arch['hidden_size'],
                         net_arch['linear_features'])

    out = jax.block_until_ready(simple_lstm_forward(x, params))
    ref = jax.block_until_ready(reference_forward(x, params))

    assert out.shape == (B, net_arch['linear_features'][-1])
    assert jnp.allclose(out, ref, atol=1e-5, rtol=1e-5), (out, ref)
    print("KERNEL_OK")
</pallas_src>

<mosaic_0001>
module attributes {stable_mosaic.version = 11 : i64} {
  func.func @kernel(%arg0: memref<64x16xf32, #tpu.memory_space<vmem>>, %arg1: memref<16x128xf32, #tpu.memory_space<vmem>>, %arg2: memref<32x128xf32, #tpu.memory_space<vmem>>, %arg3: memref<1x128xf32, #tpu.memory_space<vmem>>, %arg4: memref<64x128xf32, #tpu.memory_space<vmem>>, %arg5: memref<1x128xf32, #tpu.memory_space<vmem>>, %arg6: memref<32x16xf32, #tpu.memory_space<vmem>>, %arg7: memref<1x16xf32, #tpu.memory_space<vmem>>, %arg8: memref<16x4xf32, #tpu.memory_space<vmem>>, %arg9: memref<1x4xf32, #tpu.memory_space<vmem>>, %arg10: memref<8x4xf32, #tpu.memory_space<vmem>>) attributes {dimension_semantics = [], scalar_prefetch = 0 : i64, scratch_operands = 0 : i64, tpu.core_type = #tpu.core_type<tc>} {
    %c0 = arith.constant 0 : index
    %c0_0 = arith.constant 0 : index
    %0 = vector.load %arg1[%c0, %c0_0] : memref<16x128xf32, #tpu.memory_space<vmem>>, vector<16x128xf32>
    %c0_1 = arith.constant 0 : index
    %c0_2 = arith.constant 0 : index
    %1 = vector.load %arg2[%c0_1, %c0_2] : memref<32x128xf32, #tpu.memory_space<vmem>>, vector<32x128xf32>
    %c0_3 = arith.constant 0 : index
    %c0_4 = arith.constant 0 : index
    %2 = vector.load %arg3[%c0_3, %c0_4] : memref<1x128xf32, #tpu.memory_space<vmem>>, vector<1x128xf32>
    %c0_5 = arith.constant 0 : index
    %c0_6 = arith.constant 0 : index
    %3 = vector.load %arg4[%c0_5, %c0_6] : memref<64x128xf32, #tpu.memory_space<vmem>>, vector<64x128xf32>
    %c0_7 = arith.constant 0 : index
    %c0_8 = arith.constant 0 : index
    %4 = vector.load %arg5[%c0_7, %c0_8] : memref<1x128xf32, #tpu.memory_space<vmem>>, vector<1x128xf32>
    %c0_9 = arith.constant 0 : index
    %c0_10 = arith.constant 0 : index
    %5 = vector.load %arg0[%c0_9, %c0_10] : memref<64x16xf32, #tpu.memory_space<vmem>>, vector<64x16xf32>
    %cst = arith.constant dense<0.000000e+00> : vector<64x128xf32>
    %6 = tpu.matmul %5, %0, %cst {dimension_numbers = #tpu.dot_dimension_numbers<[1], [0], [0], [1], [0, 0, 1, 1], [], []>} : vector<64x16xf32>, vector<16x128xf32>, vector<64x128xf32> -> vector<64x128xf32>
    %7 = vector.broadcast %2 : vector<1x128xf32> to vector<64x128xf32>
    %8 = arith.addf %6, %7 : vector<64x128xf32>
    %cst_11 = arith.constant 0.000000e+00 : f32
    %9 = vector.broadcast %cst_11 : f32 to vector<8x32xf32>
    %cst_12 = arith.constant 0.000000e+00 : f32
    %10 = vector.broadcast %cst_12 : f32 to vector<8x32xf32>
    %cst_13 = arith.constant 0.000000e+00 : f32
    %11 = vector.broadcast %cst_13 : f32 to vector<8x32xf32>
    %cst_14 = arith.constant 0.000000e+00 : f32
    %12 = vector.broadcast %cst_14 : f32 to vector<8x32xf32>
    %13 = vector.extract_strided_slice %8 {offsets = [0, 0], sizes = [8, 128], strides = [1, 1]} : vector<64x128xf32> to vector<8x128xf32>
    %cst_15 = arith.constant dense<0.000000e+00> : vector<8x128xf32>
    %14 = tpu.matmul %9, %1, %cst_15 {dimension_numbers = #tpu.dot_dimension_numbers<[1], [0], [0], [1], [0, 0, 1, 1], [], []>} : vector<8x32xf32>, vector<32x128xf32>, vector<8x128xf32> -> vector<8x128xf32>
    %15 = arith.addf %13, %14 : vector<8x128xf32>
    %16 = vector.extract_strided_slice %15 {offsets = [0, 0], sizes = [8, 96], strides = [1, 1]} : vector<8x128xf32> to vector<8x96xf32>
    %17 = arith.negf %16 : vector<8x96xf32>
    %18 = math.exp %17 : vector<8x96xf32>
    %cst_16 = arith.constant 1.000000e+00 : f32
    %19 = vector.broadcast %cst_16 : f32 to vector<8x96xf32>
    %20 = arith.addf %19, %18 : vector<8x96xf32>
    %21 = arith.divf %19, %20 : vector<8x96xf32>
    %22 = vector.extract_strided_slice %15 {offsets = [0, 96], sizes = [8, 32], strides = [1, 1]} : vector<8x128xf32> to vector<8x32xf32>
    %23 = math.tanh %22 : vector<8x32xf32>
    %24 = vector.extract_strided_slice %21 {offsets = [0, 0], sizes = [8, 32], strides = [1, 1]} : vector<8x96xf32> to vector<8x32xf32>
    %25 = vector.extract_strided_slice %21 {offsets = [0, 32], sizes = [8, 32], strides = [1, 1]} : vector<8x96xf32> to vector<8x32xf32>
    %26 = vector.extract_strided_slice %21 {offsets = [0, 64], sizes = [8, 32], strides = [1, 1]} : vector<8x96xf32> to vector<8x32xf32>
    %27 = arith.mulf %25, %10 : vector<8x32xf32>
    %28 = arith.mulf %24, %23 : vector<8x32xf32>
    %29 = arith.addf %27, %28 : vector<8x32xf32>
    %30 = math.tanh %29 : vector<8x32xf32>
    %31 = arith.mulf %26, %30 : vector<8x32xf32>
    %32 = tpu.concatenate %31, %11 in 1 : vector<8x32xf32>, vector<8x32xf32> -> vector<8x64xf32>
    %cst_17 = arith.constant dense<0.000000e+00> : vector<8x128xf32>
    %33 = tpu.matmul %32, %3, %cst_17 {dimension_numbers = #tpu.dot_dimension_numbers<[1], [0], [0], [1], [0, 0, 1, 1], [], []>} : vector<8x64xf32>, vector<64x128xf32>, vector<8x128xf32> -> vector<8x128xf32>
    %34 = vector.broadcast %4 : vector<1x128xf32> to vector<8x128xf32>
    %35 = arith.addf %33, %34 : vector<8x128xf32>
    %36 = vector.extract_strided_slice %35 {offsets = [0, 0], sizes = [8, 96], strides = [1, 1]} : vector<8x128xf32> to vector<8x96xf32>
    %37 = arith.negf %36 : vector<8x96xf32>
    %38 = math.exp %37 : vector<8x96xf32>
    %cst_18 = arith.constant 1.000000e+00 : f32
    %39 = vector.broadcast %cst_18 : f32 to vector<8x96xf32>
    %40 = arith.addf %39, %38 : vector<8x96xf32>
    %41 = arith.divf %39, %40 : vector<8x96xf32>
    %42 = vector.extract_strided_slice %35 {offsets = [0, 96], sizes = [8, 32], strides = [1, 1]} : vector<8x128xf32> to vector<8x32xf32>
    %43 = math.tanh %42 : vector<8x32xf32>
    %44 = vector.extract_strided_slice %41 {offsets = [0, 0], sizes = [8, 32], strides = [1, 1]} : vector<8x96xf32> to vector<8x32xf32>
    %45 = vector.extract_strided_slice %41 {offsets = [0, 32], sizes = [8, 32], strides = [1, 1]} : vector<8x96xf32> to vector<8x32xf32>
    %46 = vector.extract_strided_slice %41 {offsets = [0, 64], sizes = [8, 32], strides = [1, 1]} : vector<8x96xf32> to vector<8x32xf32>
    %47 = arith.mulf %45, %12 : vector<8x32xf32>
    %48 = arith.mulf %44, %43 : vector<8x32xf32>
    %49 = arith.addf %47, %48 : vector<8x32xf32>
    %50 = math.tanh %49 : vector<8x32xf32>
    %51 = arith.mulf %46, %50 : vector<8x32xf32>
    %52 = vector.extract_strided_slice %8 {offsets = [8, 0], sizes = [8, 128], strides = [1, 1]} : vector<64x128xf32> to vector<8x128xf32>
    %cst_19 = arith.constant dense<0.000000e+00> : vector<8x128xf32>
    %53 = tpu.matmul %31, %1, %cst_19 {dimension_numbers = #tpu.dot_dimension_numbers<[1], [0], [0], [1], [0, 0, 1, 1], [], []>} : vector<8x32xf32>, vector<32x128xf32>, vector<8x128xf32> -> vector<8x128xf32>
    %54 = arith.addf %52, %53 : vector<8x128xf32>
    %55 = vector.extract_strided_slice %54 {offsets = [0, 0], sizes = [8, 96], strides = [1, 1]} : vector<8x128xf32> to vector<8x96xf32>
    %56 = arith.negf %55 : vector<8x96xf32>
    %57 = math.exp %56 : vector<8x96xf32>
    %cst_20 = arith.constant 1.000000e+00 : f32
    %58 = vector.broadcast %cst_20 : f32 to vector<8x96xf32>
    %59 = arith.addf %58, %57 : vector<8x96xf32>
    %60 = arith.divf %58, %59 : vector<8x96xf32>
    %61 = vector.extract_strided_slice %54 {offsets = [0, 96], sizes = [8, 32], strides = [1, 1]} : vector<8x128xf32> to vector<8x32xf32>
    %62 = math.tanh %61 : vector<8x32xf32>
    %63 = vector.extract_strided_slice %60 {offsets = [0, 0], sizes = [8, 32], strides = [1, 1]} : vector<8x96xf32> to vector<8x32xf32>
    %64 = vector.extract_strided_slice %60 {offsets = [0, 32], sizes = [8, 32], strides = [1, 1]} : vector<8x96xf32> to vector<8x32xf32>
    %65 = vector.extract_strided_slice %60 {offsets = [0, 64], sizes = [8, 32], strides = [1, 1]} : vector<8x96xf32> to vector<8x32xf32>
    %66 = arith.mulf %64, %29 : vector<8x32xf32>
    %67 = arith.mulf %63, %62 : vector<8x32xf32>
    %68 = arith.addf %66, %67 : vector<8x32xf32>
    %69 = math.tanh %68 : vector<8x32xf32>
    %70 = arith.mulf %65, %69 : vector<8x32xf32>
    %71 = tpu.concatenate %70, %51 in 1 : vector<8x32xf32>, vector<8x32xf32> -> vector<8x64xf32>
    %cst_21 = arith.constant dense<0.000000e+00> : vector<8x128xf32>
    %72 = tpu.matmul %71, %3, %cst_21 {dimension_numbers = #tpu.dot_dimension_numbers<[1], [0], [0], [1], [0, 0, 1, 1], [], []>} : vector<8x64xf32>, vector<64x128xf32>, vector<8x128xf32> -> vector<8x128xf32>
    %73 = vector.broadcast %4 : vector<1x128xf32> to vector<8x128xf32>
    %74 = arith.addf %72, %73 : vector<8x128xf32>
    %75 = vector.extract_strided_slice %74 {offsets = [0, 0], sizes = [8, 96], strides = [1, 1]} : vector<8x128xf32> to vector<8x96xf32>
    %76 = arith.negf %75 : vector<8x96xf32>
    %77 = math.exp %76 : vector<8x96xf32>
    %cst_22 = arith.constant 1.000000e+00 : f32
    %78 = vector.broadcast %cst_22 : f32 to vector<8x96xf32>
    %79 = arith.addf %78, %77 : vector<8x96xf32>
    %80 = arith.divf %78, %79 : vector<8x96xf32>
    %81 = vector.extract_strided_slice %74 {offsets = [0, 96], sizes = [8, 32], strides = [1, 1]} : vector<8x128xf32> to vector<8x32xf32>
    %82 = math.tanh %81 : vector<8x32xf32>
    %83 = vector.extract_strided_slice %80 {offsets = [0, 0], sizes = [8, 32], strides = [1, 1]} : vector<8x96xf32> to vector<8x32xf32>
    %84 = vector.extract_strided_slice %80 {offsets = [0, 32], sizes = [8, 32], strides = [1, 1]} : vector<8x96xf32> to vector<8x32xf32>
    %85 = vector.extract_strided_slice %80 {offsets = [0, 64], sizes = [8, 32], strides = [1, 1]} : vector<8x96xf32> to vector<8x32xf32>
    %86 = arith.mulf %84, %49 : vector<8x32xf32>
    %87 = arith.mulf %83, %82 : vector<8x32xf32>
    %88 = arith.addf %86, %87 : vector<8x32xf32>
    %89 = math.tanh %88 : vector<8x32xf32>
    %90 = arith.mulf %85, %89 : vector<8x32xf32>
    %91 = vector.extract_strided_slice %8 {offsets = [16, 0], sizes = [8, 128], strides = [1, 1]} : vector<64x128xf32> to vector<8x128xf32>
    %cst_23 = arith.constant dense<0.000000e+00> : vector<8x128xf32>
    %92 = tpu.matmul %70, %1, %cst_23 {dimension_numbers = #tpu.dot_dimension_numbers<[1], [0], [0], [1], [0, 0, 1, 1], [], []>} : vector<8x32xf32>, vector<32x128xf32>, vector<8x128xf32> -> vector<8x128xf32>
    %93 = arith.addf %91, %92 : vector<8x128xf32>
    %94 = vector.extract_strided_slice %93 {offsets = [0, 0], sizes = [8, 96], strides = [1, 1]} : vector<8x128xf32> to vector<8x96xf32>
    %95 = arith.negf %94 : vector<8x96xf32>
    %96 = math.exp %95 : vector<8x96xf32>
    %cst_24 = arith.constant 1.000000e+00 : f32
    %97 = vector.broadcast %cst_24 : f32 to vector<8x96xf32>
    %98 = arith.addf %97, %96 : vector<8x96xf32>
    %99 = arith.divf %97, %98 : vector<8x96xf32>
    %100 = vector.extract_strided_slice %93 {offsets = [0, 96], sizes = [8, 32], strides = [1, 1]} : vector<8x128xf32> to vector<8x32xf32>
    %101 = math.tanh %100 : vector<8x32xf32>
    %102 = vector.extract_strided_slice %99 {offsets = [0, 0], sizes = [8, 32], strides = [1, 1]} : vector<8x96xf32> to vector<8x32xf32>
    %103 = vector.extract_strided_slice %99 {offsets = [0, 32], sizes = [8, 32], strides = [1, 1]} : vector<8x96xf32> to vector<8x32xf32>
    %104 = vector.extract_strided_slice %99 {offsets = [0, 64], sizes = [8, 32], strides = [1, 1]} : vector<8x96xf32> to vector<8x32xf32>
    %105 = arith.mulf %103, %68 : vector<8x32xf32>
    %106 = arith.mulf %102, %101 : vector<8x32xf32>
    %107 = arith.addf %105, %106 : vector<8x32xf32>
    %108 = math.tanh %107 : vector<8x32xf32>
    %109 = arith.mulf %104, %108 : vector<8x32xf32>
    %110 = tpu.concatenate %109, %90 in 1 : vector<8x32xf32>, vector<8x32xf32> -> vector<8x64xf32>
    %cst_25 = arith.constant dense<0.000000e+00> : vector<8x128xf32>
    %111 = tpu.matmul %110, %3, %cst_25 {dimension_numbers = #tpu.dot_dimension_numbers<[1], [0], [0], [1], [0, 0, 1, 1], [], []>} : vector<8x64xf32>, vector<64x128xf32>, vector<8x128xf32> -> vector<8x128xf32>
    %112 = vector.broadcast %4 : vector<1x128xf32> to vector<8x128xf32>
    %113 = arith.addf %111, %112 : vector<8x128xf32>
    %114 = vector.extract_strided_slice %113 {offsets = [0, 0], sizes = [8, 96], strides = [1, 1]} : vector<8x128xf32> to vector<8x96xf32>
    %115 = arith.negf %114 : vector<8x96xf32>
    %116 = math.exp %115 : vector<8x96xf32>
    %cst_26 = arith.constant 1.000000e+00 : f32
    %117 = vector.broadcast %cst_26 : f32 to vector<8x96xf32>
    %118 = arith.addf %117, %116 : vector<8x96xf32>
    %119 = arith.divf %117, %118 : vector<8x96xf32>
    %120 = vector.extract_strided_slice %113 {offsets = [0, 96], sizes = [8, 32], strides = [1, 1]} : vector<8x128xf32> to vector<8x32xf32>
    %121 = math.tanh %120 : vector<8x32xf32>
    %122 = vector.extract_strided_slice %119 {offsets = [0, 0], sizes = [8, 32], strides = [1, 1]} : vector<8x96xf32> to vector<8x32xf32>
    %123 = vector.extract_strided_slice %119 {offsets = [0, 32], sizes = [8, 32], strides = [1, 1]} : vector<8x96xf32> to vector<8x32xf32>
    %124 = vector.extract_strided_slice %119 {offsets = [0, 64], sizes = [8, 32], strides = [1, 1]} : vector<8x96xf32> to vector<8x32xf32>
    %125 = arith.mulf %123, %88 : vector<8x32xf32>
    %126 = arith.mulf %122, %121 : vector<8x32xf32>
    %127 = arith.addf %125, %126 : vector<8x32xf32>
    %128 = math.tanh %127 : vector<8x32xf32>
    %129 = arith.mulf %124, %128 : vector<8x32xf32>
    %130 = vector.extract_strided_slice %8 {offsets = [24, 0], sizes = [8, 128], strides = [1, 1]} : vector<64x128xf32> to vector<8x128xf32>
    %cst_27 = arith.constant dense<0.000000e+00> : vector<8x128xf32>
    %131 = tpu.matmul %109, %1, %cst_27 {dimension_numbers = #tpu.dot_dimension_numbers<[1], [0], [0], [1], [0, 0, 1, 1], [], []>} : vector<8x32xf32>, vector<32x128xf32>, vector<8x128xf32> -> vector<8x128xf32>
    %132 = arith.addf %130, %131 : vector<8x128xf32>
    %133 = vector.extract_strided_slice %132 {offsets = [0, 0], sizes = [8, 96], strides = [1, 1]} : vector<8x128xf32> to vector<8x96xf32>
    %134 = arith.negf %133 : vector<8x96xf32>
    %135 = math.exp %134 : vector<8x96xf32>
    %cst_28 = arith.constant 1.000000e+00 : f32
    %136 = vector.broadcast %cst_28 : f32 to vector<8x96xf32>
    %137 = arith.addf %136, %135 : vector<8x96xf32>
    %138 = arith.divf %136, %137 : vector<8x96xf32>
    %139 = vector.extract_strided_slice %132 {offsets = [0, 96], sizes = [8, 32], strides = [1, 1]} : vector<8x128xf32> to vector<8x32xf32>
    %140 = math.tanh %139 : vector<8x32xf32>
    %141 = vector.extract_strided_slice %138 {offsets = [0, 0], sizes = [8, 32], strides = [1, 1]} : vector<8x96xf32> to vector<8x32xf32>
    %142 = vector.extract_strided_slice %138 {offsets = [0, 32], sizes = [8, 32], strides = [1, 1]} : vector<8x96xf32> to vector<8x32xf32>
    %143 = vector.extract_strided_slice %138 {offsets = [0, 64], sizes = [8, 32], strides = [1, 1]} : vector<8x96xf32> to vector<8x32xf32>
    %144 = arith.mulf %142, %107 : vector<8x32xf32>
    %145 = arith.mulf %141, %140 : vector<8x32xf32>
    %146 = arith.addf %144, %145 : vector<8x32xf32>
    %147 = math.tanh %146 : vector<8x32xf32>
    %148 = arith.mulf %143, %147 : vector<8x32xf32>
    %149 = tpu.concatenate %148, %129 in 1 : vector<8x32xf32>, vector<8x32xf32> -> vector<8x64xf32>
    %cst_29 = arith.constant dense<0.000000e+00> : vector<8x128xf32>
    %150 = tpu.matmul %149, %3, %cst_29 {dimension_numbers = #tpu.dot_dimension_numbers<[1], [0], [0], [1], [0, 0, 1, 1], [], []>} : vector<8x64xf32>, vector<64x128xf32>, vector<8x128xf32> -> vector<8x128xf32>
    %151 = vector.broadcast %4 : vector<1x128xf32> to vector<8x128xf32>
    %152 = arith.addf %150, %151 : vector<8x128xf32>
    %153 = vector.extract_strided_slice %152 {offsets = [0, 0], sizes = [8, 96], strides = [1, 1]} : vector<8x128xf32> to vector<8x96xf32>
    %154 = arith.negf %153 : vector<8x96xf32>
    %155 = math.exp %154 : vector<8x96xf32>
    %cst_30 = arith.constant 1.000000e+00 : f32
    %156 = vector.broadcast %cst_30 : f32 to vector<8x96xf32>
    %157 = arith.addf %156, %155 : vector<8x96xf32>
    %158 = arith.divf %156, %157 : vector<8x96xf32>
    %159 = vector.extract_strided_slice %152 {offsets = [0, 96], sizes = [8, 32], strides = [1, 1]} : vector<8x128xf32> to vector<8x32xf32>
    %160 = math.tanh %159 : vector<8x32xf32>
    %161 = vector.extract_strided_slice %158 {offsets = [0, 0], sizes = [8, 32], strides = [1, 1]} : vector<8x96xf32> to vector<8x32xf32>
    %162 = vector.extract_strided_slice %158 {offsets = [0, 32], sizes = [8, 32], strides = [1, 1]} : vector<8x96xf32> to vector<8x32xf32>
    %163 = vector.extract_strided_slice %158 {offsets = [0, 64], sizes = [8, 32], strides = [1, 1]} : vector<8x96xf32> to vector<8x32xf32>
    %164 = arith.mulf %162, %127 : vector<8x32xf32>
    %165 = arith.mulf %161, %160 : vector<8x32xf32>
    %166 = arith.addf %164, %165 : vector<8x32xf32>
    %167 = math.tanh %166 : vector<8x32xf32>
    %168 = arith.mulf %163, %167 : vector<8x32xf32>
    %169 = vector.extract_strided_slice %8 {offsets = [32, 0], sizes = [8, 128], strides = [1, 1]} : vector<64x128xf32> to vector<8x128xf32>
    %cst_31 = arith.constant dense<0.000000e+00> : vector<8x128xf32>
    %170 = tpu.matmul %148, %1, %cst_31 {dimension_numbers = #tpu.dot_dimension_numbers<[1], [0], [0], [1], [0, 0, 1, 1], [], []>} : vector<8x32xf32>, vector<32x128xf32>, vector<8x128xf32> -> vector<8x128xf32>
    %171 = arith.addf %169, %170 : vector<8x128xf32>
    %172 = vector.extract_strided_slice %171 {offsets = [0, 0], sizes = [8, 96], strides = [1, 1]} : vector<8x128xf32> to vector<8x96xf32>
    %173 = arith.negf %172 : vector<8x96xf32>
    %174 = math.exp %173 : vector<8x96xf32>
    %cst_32 = arith.constant 1.000000e+00 : f32
    %175 = vector.broadcast %cst_32 : f32 to vector<8x96xf32>
    %176 = arith.addf %175, %174 : vector<8x96xf32>
    %177 = arith.divf %175, %176 : vector<8x96xf32>
    %178 = vector.extract_strided_slice %171 {offsets = [0, 96], sizes = [8, 32], strides = [1, 1]} : vector<8x128xf32> to vector<8x32xf32>
    %179 = math.tanh %178 : vector<8x32xf32>
    %180 = vector.extract_strided_slice %177 {offsets = [0, 0], sizes = [8, 32], strides = [1, 1]} : vector<8x96xf32> to vector<8x32xf32>
    %181 = vector.extract_strided_slice %177 {offsets = [0, 32], sizes = [8, 32], strides = [1, 1]} : vector<8x96xf32> to vector<8x32xf32>
    %182 = vector.extract_strided_slice %177 {offsets = [0, 64], sizes = [8, 32], strides = [1, 1]} : vector<8x96xf32> to vector<8x32xf32>
    %183 = arith.mulf %181, %146 : vector<8x32xf32>
    %184 = arith.mulf %180, %179 : vector<8x32xf32>
    %185 = arith.addf %183, %184 : vector<8x32xf32>
    %186 = math.tanh %185 : vector<8x32xf32>
    %187 = arith.mulf %182, %186 : vector<8x32xf32>
    %188 = tpu.concatenate %187, %168 in 1 : vector<8x32xf32>, vector<8x32xf32> -> vector<8x64xf32>
    %cst_33 = arith.constant dense<0.000000e+00> : vector<8x128xf32>
    %189 = tpu.matmul %188, %3, %cst_33 {dimension_numbers = #tpu.dot_dimension_numbers<[1], [0], [0], [1], [0, 0, 1, 1], [], []>} : vector<8x64xf32>, vector<64x128xf32>, vector<8x128xf32> -> vector<8x128xf32>
    %190 = vector.broadcast %4 : vector<1x128xf32> to vector<8x128xf32>
    %191 = arith.addf %189, %190 : vector<8x128xf32>
    %192 = vector.extract_strided_slice %191 {offsets = [0, 0], sizes = [8, 96], strides = [1, 1]} : vector<8x128xf32> to vector<8x96xf32>
    %193 = arith.negf %192 : vector<8x96xf32>
    %194 = math.exp %193 : vector<8x96xf32>
    %cst_34 = arith.constant 1.000000e+00 : f32
    %195 = vector.broadcast %cst_34 : f32 to vector<8x96xf32>
    %196 = arith.addf %195, %194 : vector<8x96xf32>
    %197 = arith.divf %195, %196 : vector<8x96xf32>
    %198 = vector.extract_strided_slice %191 {offsets = [0, 96], sizes = [8, 32], strides = [1, 1]} : vector<8x128xf32> to vector<8x32xf32>
    %199 = math.tanh %198 : vector<8x32xf32>
    %200 = vector.extract_strided_slice %197 {offsets = [0, 0], sizes = [8, 32], strides = [1, 1]} : vector<8x96xf32> to vector<8x32xf32>
    %201 = vector.extract_strided_slice %197 {offsets = [0, 32], sizes = [8, 32], strides = [1, 1]} : vector<8x96xf32> to vector<8x32xf32>
    %202 = vector.extract_strided_slice %197 {offsets = [0, 64], sizes = [8, 32], strides = [1, 1]} : vector<8x96xf32> to vector<8x32xf32>
    %203 = arith.mulf %201, %166 : vector<8x32xf32>
    %204 = arith.mulf %200, %199 : vector<8x32xf32>
    %205 = arith.addf %203, %204 : vector<8x32xf32>
    %206 = math.tanh %205 : vector<8x32xf32>
    %207 = arith.mulf %202, %206 : vector<8x32xf32>
    %208 = vector.extract_strided_slice %8 {offsets = [40, 0], sizes = [8, 128], strides = [1, 1]} : vector<64x128xf32> to vector<8x128xf32>
    %cst_35 = arith.constant dense<0.000000e+00> : vector<8x128xf32>
    %209 = tpu.matmul %187, %1, %cst_35 {dimension_numbers = #tpu.dot_dimension_numbers<[1], [0], [0], [1], [0, 0, 1, 1], [], []>} : vector<8x32xf32>, vector<32x128xf32>, vector<8x128xf32> -> vector<8x128xf32>
    %210 = arith.addf %208, %209 : vector<8x128xf32>
    %211 = vector.extract_strided_slice %210 {offsets = [0, 0], sizes = [8, 96], strides = [1, 1]} : vector<8x128xf32> to vector<8x96xf32>
    %212 = arith.negf %211 : vector<8x96xf32>
    %213 = math.exp %212 : vector<8x96xf32>
    %cst_36 = arith.constant 1.000000e+00 : f32
    %214 = vector.broadcast %cst_36 : f32 to vector<8x96xf32>
    %215 = arith.addf %214, %213 : vector<8x96xf32>
    %216 = arith.divf %214, %215 : vector<8x96xf32>
    %217 = vector.extract_strided_slice %210 {offsets = [0, 96], sizes = [8, 32], strides = [1, 1]} : vector<8x128xf32> to vector<8x32xf32>
    %218 = math.tanh %217 : vector<8x32xf32>
    %219 = vector.extract_strided_slice %216 {offsets = [0, 0], sizes = [8, 32], strides = [1, 1]} : vector<8x96xf32> to vector<8x32xf32>
    %220 = vector.extract_strided_slice %216 {offsets = [0, 32], sizes = [8, 32], strides = [1, 1]} : vector<8x96xf32> to vector<8x32xf32>
    %221 = vector.extract_strided_slice %216 {offsets = [0, 64], sizes = [8, 32], strides = [1, 1]} : vector<8x96xf32> to vector<8x32xf32>
    %222 = arith.mulf %220, %185 : vector<8x32xf32>
    %223 = arith.mulf %219, %218 : vector<8x32xf32>
    %224 = arith.addf %222, %223 : vector<8x32xf32>
    %225 = math.tanh %224 : vector<8x32xf32>
    %226 = arith.mulf %221, %225 : vector<8x32xf32>
    %227 = tpu.concatenate %226, %207 in 1 : vector<8x32xf32>, vector<8x32xf32> -> vector<8x64xf32>
    %cst_37 = arith.constant dense<0.000000e+00> : vector<8x128xf32>
    %228 = tpu.matmul %227, %3, %cst_37 {dimension_numbers = #tpu.dot_dimension_numbers<[1], [0], [0], [1], [0, 0, 1, 1], [], []>} : vector<8x64xf32>, vector<64x128xf32>, vector<8x128xf32> -> vector<8x128xf32>
    %229 = vector.broadcast %4 : vector<1x128xf32> to vector<8x128xf32>
    %230 = arith.addf %228, %229 : vector<8x128xf32>
    %231 = vector.extract_strided_slice %230 {offsets = [0, 0], sizes = [8, 96], strides = [1, 1]} : vector<8x128xf32> to vector<8x96xf32>
    %232 = arith.negf %231 : vector<8x96xf32>
    %233 = math.exp %232 : vector<8x96xf32>
    %cst_38 = arith.constant 1.000000e+00 : f32
    %234 = vector.broadcast %cst_38 : f32 to vector<8x96xf32>
    %235 = arith.addf %234, %233 : vector<8x96xf32>
    %236 = arith.divf %234, %235 : vector<8x96xf32>
    %237 = vector.extract_strided_slice %230 {offsets = [0, 96], sizes = [8, 32], strides = [1, 1]} : vector<8x128xf32> to vector<8x32xf32>
    %238 = math.tanh %237 : vector<8x32xf32>
    %239 = vector.extract_strided_slice %236 {offsets = [0, 0], sizes = [8, 32], strides = [1, 1]} : vector<8x96xf32> to vector<8x32xf32>
    %240 = vector.extract_strided_slice %236 {offsets = [0, 32], sizes = [8, 32], strides = [1, 1]} : vector<8x96xf32> to vector<8x32xf32>
    %241 = vector.extract_strided_slice %236 {offsets = [0, 64], sizes = [8, 32], strides = [1, 1]} : vector<8x96xf32> to vector<8x32xf32>
    %242 = arith.mulf %240, %205 : vector<8x32xf32>
    %243 = arith.mulf %239, %238 : vector<8x32xf32>
    %244 = arith.addf %242, %243 : vector<8x32xf32>
    %245 = math.tanh %244 : vector<8x32xf32>
    %246 = arith.mulf %241, %245 : vector<8x32xf32>
    %247 = vector.extract_strided_slice %8 {offsets = [48, 0], sizes = [8, 128], strides = [1, 1]} : vector<64x128xf32> to vector<8x128xf32>
    %cst_39 = arith.constant dense<0.000000e+00> : vector<8x128xf32>
    %248 = tpu.matmul %226, %1, %cst_39 {dimension_numbers = #tpu.dot_dimension_numbers<[1], [0], [0], [1], [0, 0, 1, 1], [], []>} : vector<8x32xf32>, vector<32x128xf32>, vector<8x128xf32> -> vector<8x128xf32>
    %249 = arith.addf %247, %248 : vector<8x128xf32>
    %250 = vector.extract_strided_slice %249 {offsets = [0, 0], sizes = [8, 96], strides = [1, 1]} : vector<8x128xf32> to vector<8x96xf32>
    %251 = arith.negf %250 : vector<8x96xf32>
    %252 = math.exp %251 : vector<8x96xf32>
    %cst_40 = arith.constant 1.000000e+00 : f32
    %253 = vector.broadcast %cst_40 : f32 to vector<8x96xf32>
    %254 = arith.addf %253, %252 : vector<8x96xf32>
    %255 = arith.divf %253, %254 : vector<8x96xf32>
    %256 = vector.extract_strided_slice %249 {offsets = [0, 96], sizes = [8, 32], strides = [1, 1]} : vector<8x128xf32> to vector<8x32xf32>
    %257 = math.tanh %256 : vector<8x32xf32>
    %258 = vector.extract_strided_slice %255 {offsets = [0, 0], sizes = [8, 32], strides = [1, 1]} : vector<8x96xf32> to vector<8x32xf32>
    %259 = vector.extract_strided_slice %255 {offsets = [0, 32], sizes = [8, 32], strides = [1, 1]} : vector<8x96xf32> to vector<8x32xf32>
    %260 = vector.extract_strided_slice %255 {offsets = [0, 64], sizes = [8, 32], strides = [1, 1]} : vector<8x96xf32> to vector<8x32xf32>
    %261 = arith.mulf %259, %224 : vector<8x32xf32>
    %262 = arith.mulf %258, %257 : vector<8x32xf32>
    %263 = arith.addf %261, %262 : vector<8x32xf32>
    %264 = math.tanh %263 : vector<8x32xf32>
    %265 = arith.mulf %260, %264 : vector<8x32xf32>
    %266 = tpu.concatenate %265, %246 in 1 : vector<8x32xf32>, vector<8x32xf32> -> vector<8x64xf32>
    %cst_41 = arith.constant dense<0.000000e+00> : vector<8x128xf32>
    %267 = tpu.matmul %266, %3, %cst_41 {dimension_numbers = #tpu.dot_dimension_numbers<[1], [0], [0], [1], [0, 0, 1, 1], [], []>} : vector<8x64xf32>, vector<64x128xf32>, vector<8x128xf32> -> vector<8x128xf32>
    %268 = vector.broadcast %4 : vector<1x128xf32> to vector<8x128xf32>
    %269 = arith.addf %267, %268 : vector<8x128xf32>
    %270 = vector.extract_strided_slice %269 {offsets = [0, 0], sizes = [8, 96], strides = [1, 1]} : vector<8x128xf32> to vector<8x96xf32>
    %271 = arith.negf %270 : vector<8x96xf32>
    %272 = math.exp %271 : vector<8x96xf32>
    %cst_42 = arith.constant 1.000000e+00 : f32
    %273 = vector.broadcast %cst_42 : f32 to vector<8x96xf32>
    %274 = arith.addf %273, %272 : vector<8x96xf32>
    %275 = arith.divf %273, %274 : vector<8x96xf32>
    %276 = vector.extract_strided_slice %269 {offsets = [0, 96], sizes = [8, 32], strides = [1, 1]} : vector<8x128xf32> to vector<8x32xf32>
    %277 = math.tanh %276 : vector<8x32xf32>
    %278 = vector.extract_strided_slice %275 {offsets = [0, 0], sizes = [8, 32], strides = [1, 1]} : vector<8x96xf32> to vector<8x32xf32>
    %279 = vector.extract_strided_slice %275 {offsets = [0, 32], sizes = [8, 32], strides = [1, 1]} : vector<8x96xf32> to vector<8x32xf32>
    %280 = vector.extract_strided_slice %275 {offsets = [0, 64], sizes = [8, 32], strides = [1, 1]} : vector<8x96xf32> to vector<8x32xf32>
    %281 = arith.mulf %279, %244 : vector<8x32xf32>
    %282 = arith.mulf %278, %277 : vector<8x32xf32>
    %283 = arith.addf %281, %282 : vector<8x32xf32>
    %284 = math.tanh %283 : vector<8x32xf32>
    %285 = arith.mulf %280, %284 : vector<8x32xf32>
    %286 = vector.extract_strided_slice %8 {offsets = [56, 0], sizes = [8, 128], strides = [1, 1]} : vector<64x128xf32> to vector<8x128xf32>
    %cst_43 = arith.constant dense<0.000000e+00> : vector<8x128xf32>
    %287 = tpu.matmul %265, %1, %cst_43 {dimension_numbers = #tpu.dot_dimension_numbers<[1], [0], [0], [1], [0, 0, 1, 1], [], []>} : vector<8x32xf32>, vector<32x128xf32>, vector<8x128xf32> -> vector<8x128xf32>
    %288 = arith.addf %286, %287 : vector<8x128xf32>
    %289 = vector.extract_strided_slice %288 {offsets = [0, 0], sizes = [8, 96], strides = [1, 1]} : vector<8x128xf32> to vector<8x96xf32>
    %290 = arith.negf %289 : vector<8x96xf32>
    %291 = math.exp %290 : vector<8x96xf32>
    %cst_44 = arith.constant 1.000000e+00 : f32
    %292 = vector.broadcast %cst_44 : f32 to vector<8x96xf32>
    %293 = arith.addf %292, %291 : vector<8x96xf32>
    %294 = arith.divf %292, %293 : vector<8x96xf32>
    %295 = vector.extract_strided_slice %288 {offsets = [0, 96], sizes = [8, 32], strides = [1, 1]} : vector<8x128xf32> to vector<8x32xf32>
    %296 = math.tanh %295 : vector<8x32xf32>
    %297 = vector.extract_strided_slice %294 {offsets = [0, 0], sizes = [8, 32], strides = [1, 1]} : vector<8x96xf32> to vector<8x32xf32>
    %298 = vector.extract_strided_slice %294 {offsets = [0, 32], sizes = [8, 32], strides = [1, 1]} : vector<8x96xf32> to vector<8x32xf32>
    %299 = vector.extract_strided_slice %294 {offsets = [0, 64], sizes = [8, 32], strides = [1, 1]} : vector<8x96xf32> to vector<8x32xf32>
    %300 = arith.mulf %298, %263 : vector<8x32xf32>
    %301 = arith.mulf %297, %296 : vector<8x32xf32>
    %302 = arith.addf %300, %301 : vector<8x32xf32>
    %303 = math.tanh %302 : vector<8x32xf32>
    %304 = arith.mulf %299, %303 : vector<8x32xf32>
    %305 = tpu.concatenate %304, %285 in 1 : vector<8x32xf32>, vector<8x32xf32> -> vector<8x64xf32>
    %cst_45 = arith.constant dense<0.000000e+00> : vector<8x128xf32>
    %306 = tpu.matmul %305, %3, %cst_45 {dimension_numbers = #tpu.dot_dimension_numbers<[1], [0], [0], [1], [0, 0, 1, 1], [], []>} : vector<8x64xf32>, vector<64x128xf32>, vector<8x128xf32> -> vector<8x128xf32>
    %307 = vector.broadcast %4 : vector<1x128xf32> to vector<8x128xf32>
    %308 = arith.addf %306, %307 : vector<8x128xf32>
    %309 = vector.extract_strided_slice %308 {offsets = [0, 0], sizes = [8, 96], strides = [1, 1]} : vector<8x128xf32> to vector<8x96xf32>
    %310 = arith.negf %309 : vector<8x96xf32>
    %311 = math.exp %310 : vector<8x96xf32>
    %cst_46 = arith.constant 1.000000e+00 : f32
    %312 = vector.broadcast %cst_46 : f32 to vector<8x96xf32>
    %313 = arith.addf %312, %311 : vector<8x96xf32>
    %314 = arith.divf %312, %313 : vector<8x96xf32>
    %315 = vector.extract_strided_slice %308 {offsets = [0, 96], sizes = [8, 32], strides = [1, 1]} : vector<8x128xf32> to vector<8x32xf32>
    %316 = math.tanh %315 : vector<8x32xf32>
    %317 = vector.extract_strided_slice %314 {offsets = [0, 0], sizes = [8, 32], strides = [1, 1]} : vector<8x96xf32> to vector<8x32xf32>
    %318 = vector.extract_strided_slice %314 {offsets = [0, 32], sizes = [8, 32], strides = [1, 1]} : vector<8x96xf32> to vector<8x32xf32>
    %319 = vector.extract_strided_slice %314 {offsets = [0, 64], sizes = [8, 32], strides = [1, 1]} : vector<8x96xf32> to vector<8x32xf32>
    %320 = arith.mulf %318, %283 : vector<8x32xf32>
    %321 = arith.mulf %317, %316 : vector<8x32xf32>
    %322 = arith.addf %320, %321 : vector<8x32xf32>
    %323 = math.tanh %322 : vector<8x32xf32>
    %324 = arith.mulf %319, %323 : vector<8x32xf32>
    %c0_47 = arith.constant 0 : index
    %c0_48 = arith.constant 0 : index
    %325 = vector.load %arg6[%c0_47, %c0_48] : memref<32x16xf32, #tpu.memory_space<vmem>>, vector<32x16xf32>
    %cst_49 = arith.constant dense<0.000000e+00> : vector<8x16xf32>
    %326 = tpu.matmul %324, %325, %cst_49 {dimension_numbers = #tpu.dot_dimension_numbers<[1], [0], [0], [1], [0, 0, 1, 1], [], []>} : vector<8x32xf32>, vector<32x16xf32>, vector<8x16xf32> -> vector<8x16xf32>
    %c0_50 = arith.constant 0 : index
    %c0_51 = arith.constant 0 : index
    %327 = vector.load %arg7[%c0_50, %c0_51] : memref<1x16xf32, #tpu.memory_space<vmem>>, vector<1x16xf32>
    %328 = vector.broadcast %327 : vector<1x16xf32> to vector<8x16xf32>
    %329 = arith.addf %326, %328 : vector<8x16xf32>
    %cst_52 = arith.constant 0.000000e+00 : f32
    %330 = vector.broadcast %cst_52 : f32 to vector<8x16xf32>
    %331 = arith.maximumf %329, %330 : vector<8x16xf32>
    %c0_53 = arith.constant 0 : index
    %c0_54 = arith.constant 0 : index
    %332 = vector.load %arg8[%c0_53, %c0_54] : memref<16x4xf32, #tpu.memory_space<vmem>>, vector<16x4xf32>
    %cst_55 = arith.constant dense<0.000000e+00> : vector<8x4xf32>
    %333 = tpu.matmul %331, %332, %cst_55 {dimension_numbers = #tpu.dot_dimension_numbers<[1], [0], [0], [1], [0, 0, 1, 1], [], []>} : vector<8x16xf32>, vector<16x4xf32>, vector<8x4xf32> -> vector<8x4xf32>
    %c0_56 = arith.constant 0 : index
    %c0_57 = arith.constant 0 : index
    %334 = vector.load %arg9[%c0_56, %c0_57] : memref<1x4xf32, #tpu.memory_space<vmem>>, vector<1x4xf32>
    %335 = vector.broadcast %334 : vector<1x4xf32> to vector<8x4xf32>
    %336 = arith.addf %333, %335 : vector<8x4xf32>
    %337 = arith.negf %336 : vector<8x4xf32>
    %338 = math.exp %337 : vector<8x4xf32>
    %cst_58 = arith.constant 1.000000e+00 : f32
    %339 = vector.broadcast %cst_58 : f32 to vector<8x4xf32>
    %340 = arith.addf %339, %338 : vector<8x4xf32>
    %341 = arith.divf %339, %340 : vector<8x4xf32>
    %c0_59 = arith.constant 0 : index
    %c0_60 = arith.constant 0 : index
    %342 = vector.load %arg10[%c0_59, %c0_60] : memref<8x4xf32, #tpu.memory_space<vmem>>, vector<8x4xf32>
    tpu.vector_store %arg10[%c0_59, %c0_60], %341 {strides = array<i32>} : memref<8x4xf32, #tpu.memory_space<vmem>>, vector<8x4xf32>,
    return
  }
}

</mosaic_0001>

<bundles_post_ra>
// kernel: tpu_custom_call.1
= control target key start
LH: loop header
LB: loop body
LE: loop exit
PB: predicated region body
PF: predicated region fallthrough
CT: control target
= control target key end

     0   :  { %vm65_vm0 = vcmask 130048   ;;  %v2750_v0 = vmov 0.0|0.0   ;;  %vm2751_vm1 = vmmov 0   ;;  %v2752_v4 = vmov 0.0   ;;  %s2753_s29 = smov 32   ;;  %s3240_s1 = inlined_call_operand.vmem [shape: f32[16,128], index: 1, kind: input, shape index: {}]   ;;  %s3241_s2 = inlined_call_operand.vmem [shape: f32[32,128], index: 2, kind: input, shape index: {}]   ;;  %s3242_s0 = inlined_call_operand.vmem [shape: f32[64,16], index: 0, kind: input, shape index: {}]   ;;  %s3243_s3 = inlined_call_operand.vmem [shape: f32[1,128], index: 3, kind: input, shape index: {}]   ;;  %s3244_s4 = inlined_call_operand.vmem [shape: f32[64,128], index: 4, kind: input, shape index: {}]   ;;  %s3245_s5 = inlined_call_operand.vmem [shape: f32[1,128], index: 5, kind: input, shape index: {}]   ;;  %s3246_s6 = inlined_call_operand.vmem [shape: f32[32,16], index: 6, kind: input, shape index: {}]   ;;  %s3247_s8 = inlined_call_operand.vmem [shape: f32[16,4], index: 8, kind: input, shape index: {}]   ;;  %s3248_s7 = inlined_call_operand.vmem [shape: f32[1,16], index: 7, kind: input, shape index: {}]   ;;  %s3249_s9 = inlined_call_operand.vmem [shape: f32[1,4], index: 9, kind: input, shape index: {}]   ;;  %s3250_s10 = inlined_call_operand.vmem [shape: f32[8,4], index: 10, kind: output, shape index: {}]  }
   0x1   :  { %2459 = vmatprep.subr.bf16.mxu1 %v2750_v0  ;;  %v35_v1 = vld [vmem:[%s3240_s1] sm:$0xff]  ;;  %v36_v2 = vld [vmem:[%s3240_s1 + $0x8] sm:$0xff]  ;;  %2205 = vmatprep.mubr.msk.f32.mxu1 %vm2751_vm1, %v2752_v4  ;;  %v39_v9 = vld [vmem:[%s3241_s2 + $0x10] sm:$0xff]  ;;  %vm195_vm2 = vcmask 261120   ;;  %vm305_vm3 = vcmask 523264   ;;  %vm1999_vm4 = vcmask 31744  }
   0x2   :  { %v37_v3 = vld [vmem:[%s3241_s2] sm:$0xff]  ;;  %v2455_v5 = vpack.c.bf16 %v36_v2, %v35_v1  ;;  %v38_v6 = vld [vmem:[%s3241_s2 + $0x8] sm:$0xff]  ;;  %v40_v10 = vld [vmem:[%s3241_s2 + $0x18] sm:$0xff] }
   0x3   :  { %v51_v7 = vld [vmem:[%s3242_s0] sm:$0xff]  ;;  %v2829_v8 = vpack.c.bf16 %v38_v6, %v37_v3  ;;  %v52_v11 = vld [vmem:[%s3242_s0 + $0x8] sm:$0xff]  ;;  %v2842_v12 = vpack.c.bf16 %v40_v10, %v39_v9  ;;  %v53_v30 = vld [vmem:[%s3242_s0 + $0x10] sm:$0xff] }
   0x4   :  { %2185 = vmatprep.mubr.msk.f32.mxu0 %vm65_vm0, %v51_v7  ;;  %2456 = vmatprep.subr.bf16.mxu0 %v2455_v5  ;;  %v2859_v13 = vld [vmem:[%s3243_s3] ss:$0 sm:$0xff]  ;;  %v54_v31 = vld [vmem:[%s3242_s0 + $0x18] sm:$0xff]  ;;  %v43_v34 = vld [vmem:[%s3244_s4 + $0x8] sm:$0xff] }
   0x5   :  { %2461 = vmatpush3.bf16.msra.mxu1 %v2829_v8  ;;  %2458 = vmatpush3.bf16.msra.mxu0 %v2455_v5  ;;  %v55_v32 = vld [vmem:[%s3242_s0 + $0x20] sm:$0xff]  ;;  %v44_v35 = vld [vmem:[%s3244_s4 + $0x10] sm:$0xff]  ;;  %v45_v37 = vld [vmem:[%s3244_s4 + $0x18] sm:$0xff] }
   0x6   :  { %2462 = vmatprep.subr.bf16.mxu1 %v2750_v0  ;;  %2465 = vmatprep.subr.bf16.mxu0 %v2750_v0  ;;  %v42_v33 = vld [vmem:[%s3244_s4] sm:$0xff]  ;;  %v56_v38 = vld [vmem:[%s3242_s0 + $0x28] sm:$0xff]  ;;  %v2899_v39 = vpack.c.bf16 %v45_v37, %v44_v35  ;;  %v57_v40 = vld [vmem:[%s3242_s0 + $0x30] sm:$0xff] }
   0x7   :  { %v2888_v36 = vpack.c.bf16 %v43_v34, %v42_v33  ;;  %v46_v41 = vld [vmem:[%s3244_s4 + $0x20] sm:$0xff]  ;;  %v47_v42 = vld [vmem:[%s3244_s4 + $0x28] sm:$0xff]  ;;  %v58_v43 = vld [vmem:[%s3242_s0 + $0x38] sm:$0xff]  ;;  %s2754_s0 = smov 64  }
   0x8   :  { %2186 = vmatmul.mubr.msk.f32.vlgmr.msra.gmra.mrb[0].mxu0 %vm65_vm0, %v52_v11  ;;  %v2917_v44 = vpack.c.bf16 %v47_v42, %v46_v41  ;;  %v48_v45 = vld [vmem:[%s3244_s4 + $0x30] sm:$0xff]  ;;  %v49_v46 = vld [vmem:[%s3244_s4 + $0x38] sm:$0xff]  ;;  %v2973_v60 = vld [vmem:[%s3245_s5] ss:$0 sm:$0xff]  ;;  %s2755_s5 = smov 96  }
   0x9   :  { %2464 = vmatpush3.bf16.msra.mxu1 %v2842_v12  ;;  %2188 = vmatprep.mubr.msk.f32.mxu0 %vm65_vm0, %v53_v30  ;;  %v2931_v48 = vpack.c.bf16 %v49_v46, %v48_v45 }
   0xa   :  { %2477 = vmatprep.subr.bf16.mxu1 %v2750_v0  ;;  %2467 = vmatpush3.bf16.msra.mxu0 %v2888_v36 }
   0xb   :  { %2468 = vmatprep.subr.bf16.mxu0 %v2750_v0 }
   0xc   :  { %2206 = vmatmul.mubr.f32.vlgmr.msra.gmra.mrb[0].mxu1 %v2752_v4  ;;  %2189 = vmatmul.mubr.msk.f32.gmra.mrb[2].mxu0 %vm65_vm0, %v54_v31 }
   0xd   :  { %2479 = vmatpush3.bf16.msra.mxu1 %v2829_v8  ;;  %2235 = vmatprep.mubr.msk.f32.mxu1 %vm2751_vm1, %v2752_v4 }
   0xe   :  { %2480 = vmatprep.subr.bf16.mxu1 %v2750_v0  ;;  %2191 = vmatprep.mubr.msk.f32.mxu0 %vm65_vm0, %v55_v32 }
   0xf   :  { %2470 = vmatpush3.bf16.msra.mxu0 %v2899_v39 }
  0x10   :  { %2192 = vmatmul.mubr.msk.f32.gmra.mrb[4].mxu0 %vm65_vm0, %v56_v38  ;;  %2471 = vmatprep.subr.bf16.mxu0 %v2750_v0 }
  0x11   :  { %2482 = vmatpush3.bf16.msra.mxu1 %v2842_v12  ;;  %2194 = vmatprep.mubr.msk.f32.mxu0 %vm65_vm0, %v57_v40 }
  0x12   :  { %2483 = vmatprep.subr.bf16.mxu1 %v2750_v0 }
  0x13   :  { %2473 = vmatpush3.bf16.msra.mxu0 %v2917_v44 }
  0x14   :  { %2195 = vmatmul.mubr.msk.f32.gmra.mrb[6].mxu0 %vm65_vm0, %v58_v43  ;;  %2474 = vmatprep.subr.bf16.mxu0 %v2750_v0 }
  0x15   :  { %2224 = vmatprep.mubr.msk.f32.mxu0 %vm2751_vm1, %v2752_v4 }
  0x17   :  { %2476 = vmatpush3.bf16.msra.mxu0 %v2931_v48 }
  0x18   :  { %2495 = vmatprep.subr.bf16.mxu0 %v2750_v0 }
  0xdb   :  { %v2861_v14 = vpop.f32.mrb[0].mxu0 }
  0xdc   :  { %v156_v15 = vpop.f32.mrb[1].mxu0  ;;  %v162_v59 = vadd.f32 %v2861_v14, %v2859_v13 }
  0xdd   :  { %v157_v16 = vadd.f32 %v2859_v13, %v156_v15 }
  0xdf   :  { %v265_v17 = vpop.f32.mrb[0].mxu1  ;;  %v2937_v51 = vpop.f32.mrb[2].mxu0 }
  0xe0   :  { %v269_v18 = vadd.f32 %v265_v17, %v157_v16  ;;  %v2207_v19 = vpop.f32.mrb[1].mxu1  ;;  %v2939_v52 = vpop.f32.mrb[3].mxu0 }
  0xe1   :  { %v167_v38 = vadd.f32 %v2859_v13, %v2939_v52 }
  0xe2   :  { %2618 = vtanh.f32 %v269_v18  ;;  %v2014_v21 = vmul.f32 -1.442695, %v269_v18 }
  0xe3   :  { %v2941_v53 = vpop.f32.mrb[4].mxu0 }
  0xe4   :  { %2620 = vpow2.f32 %v2014_v21  ;;  %v2943_v54 = vpop.f32.mrb[5].mxu0 }
  0xe7   :  { %v2945_v55 = vpop.f32.mrb[6].mxu0 }
  0xe8   :  { %v2947_v56 = vpop.f32.mrb[7].mxu0 }
  0xec   :  { %v2619_v20 = vpop.eup %2618 }
  0xed   :  { %279 = vrot.lane.b32.xlu0 %v2619_v20, %s2753_s29 }
  0xee   :  { %v2621_v22 = vpop.eup %2620 }
  0xef   :  { %v273_v23 = vadd.f32 1.0, %v2621_v22 }
  0xf1   :  { %2622 = vrcp.f32 %v273_v23 }
  0xfb   :  { %v2623_v24 = vpop.eup %2622 }
  0xfc   :  { %v277_v27 = vmul.f32 0.0, %v2623_v24 }
 0x15f   :  { %v280_v25 = vpop.permute.xlu0 %279 }
 0x160   :  { %v282_v26 = vmul.f32 %v2623_v24, %v280_v25 }
 0x162   :  { %284 = vrot.lane.b32.xlu0 %v282_v26, %s2753_s29 }
 0x1d4   :  { %v285_v28 = vpop.permute.xlu0 %284 }
 0x1d5   :  { %v2866_v29 = vadd.f32 %v285_v28, %v277_v27 }
 0x1d7   :  { %2624 = vtanh.f32 %v2866_v29 }
 0x1e1   :  { %v2625_v47 = vpop.eup %2624 }
 0x1e2   :  { %290 = vrot.lane.b32.xlu1 %v2625_v47, %s2753_s29 }
 0x254   :  { %v291_v49 = vpop.permute.xlu1 %290 }
 0x255   :  { %v293_v50 = vmul.f32 %v2623_v24, %v291_v49 }
 0x257   :  { %295 = vrot.lane.b32.xlu1 %v293_v50, %s2754_s0 }
 0x2c9   :  { %v296_v57 = vpop.permute.xlu1 %295 }
 0x2ca   :  { %v298_v58 = vsel %vm195_vm2, %v296_v57, 0.0  ;;  %2236 = vmatmul.mubr.msk.f32.vlgmr.msra.gmra.mrb[2].mxu1 %vm195_vm2, %v296_v57 }
 0x2cb   :  { %2225 = vmatmul.mubr.msk.f32.vlgmr.msra.gmra.mrb[8].mxu0 %vm305_vm3, %v298_v58  ;;  %2485 = vmatpush3.bf16.msra.mxu1 %v2888_v36 }
 0x2cc   :  { %2486 = vmatprep.subr.bf16.mxu1 %v2750_v0  ;;  %2497 = vmatpush3.bf16.msra.mxu0 %v2829_v8 }
 0x2cd   :  { %2498 = vmatprep.subr.bf16.mxu0 %v2750_v0  ;;  %2265 = vmatprep.mubr.msk.f32.mxu0 %vm2751_vm1, %v2752_v4 }
 0x2ce   :  { %2254 = vmatprep.mubr.msk.f32.mxu1 %vm2751_vm1, %v2752_v4 }
 0x2cf   :  { %2488 = vmatpush3.bf16.msra.mxu1 %v2899_v39 }
 0x2d0   :  { %2489 = vmatprep.subr.bf16.mxu1 %v2750_v0  ;;  %2500 = vmatpush3.bf16.msra.mxu0 %v2842_v12 }
 0x2d1   :  { %2501 = vmatprep.subr.bf16.mxu0 %v2750_v0 }
 0x2d3   :  { %2491 = vmatpush3.bf16.msra.mxu1 %v2917_v44 }
 0x2d4   :  { %2492 = vmatprep.subr.bf16.mxu1 %v2750_v0 }
 0x2d7   :  { %2494 = vmatpush3.bf16.msra.mxu1 %v2931_v48 }
 0x2d8   :  { %2513 = vmatprep.subr.bf16.mxu1 %v2750_v0 }
 0x39d   :  { %v471_v61 = vpop.f32.mrb[2].mxu1 }
 0x39e   :  { %v475_v62 = vadd.f32 %v471_v61, %v162_v59  ;;  %v375_v63 = vpop.f32.mrb[8].mxu0  ;;  %v2237_v1 = vpop.f32.mrb[3].mxu1 }
 0x39f   :  { %v376_v2 = vadd.f32 %v2973_v60, %v375_v63  ;;  %v2226_v3 = vpop.f32.mrb[9].mxu0 }
 0x3a0   :  { %2626 = vtanh.f32 %v475_v62  ;;  %v2019_v7 = vmul.f32 -1.442695, %v475_v62 }
 0x3a1   :  { %2628 = vtanh.f32 %v376_v2  ;;  %v2017_v9 = vmul.f32 -1.442695, %v376_v2 }
 0x3a2   :  { %2630 = vpow2.f32 %v2019_v7 }
 0x3a3   :  { %2632 = vpow2.f32 %v2017_v9 }
 0x3aa   :  { %v2627_v5 = vpop.eup %2626 }
 0x3ab   :  { %v2629_v6 = vpop.eup %2628  ;;  %485 = vrot.lane.b32.xlu1 %v2627_v5, %s2753_s29 }
 0x3ac   :  { %388 = vrot.lane.b32.xlu0 %v2629_v6, %s2753_s29  ;;  %v2631_v10 = vpop.eup %2630 }
 0x3ad   :  { %v2633_v11 = vpop.eup %2632  ;;  %v479_v14 = vadd.f32 1.0, %v2631_v10 }
 0x3ae   :  { %v382_v15 = vadd.f32 1.0, %v2633_v11 }
 0x3af   :  { %2634 = vrcp.f32 %v479_v14 }
 0x3b0   :  { %2636 = vrcp.f32 %v382_v15 }
 0x3b9   :  { %v2635_v16 = vpop.eup %2634 }
 0x3ba   :  { %v2637_v18 = vpop.eup %2636  ;;  %v483_v22 = vmul.f32 %v2635_v16, %v2866_v29 }
 0x3bb   :  { %v386_v24 = vmul.f32 0.0, %v2637_v18 }
 0x41d   :  { %v486_v17 = vpop.permute.xlu1 %485 }
 0x41e   :  { %v488_v19 = vmul.f32 %v2635_v16, %v486_v17  ;;  %v389_v20 = vpop.permute.xlu0 %388 }
 0x41f   :  { %v391_v21 = vmul.f32 %v2637_v18, %v389_v20 }
 0x420   :  { %490 = vrot.lane.b32.xlu1 %v488_v19, %s2753_s29 }
 0x421   :  { %393 = vrot.lane.b32.xlu0 %v391_v21, %s2753_s29 }
 0x492   :  { %v491_v23 = vpop.permute.xlu1 %490 }
 0x493   :  { %v2981_v25 = vadd.f32 %v491_v23, %v483_v22  ;;  %v394_v26 = vpop.permute.xlu0 %393 }
 0x494   :  { %v2983_v27 = vadd.f32 %v394_v26, %v386_v24  ;;  %v172_v24 = vadd.f32 %v2937_v51, %v2859_v13 }
 0x495   :  { %2638 = vtanh.f32 %v2981_v25 }
 0x496   :  { %2640 = vtanh.f32 %v2983_v27 }
 0x49f   :  { %v2639_v28 = vpop.eup %2638 }
 0x4a0   :  { %v2641_v30 = vpop.eup %2640  ;;  %496 = vrot.lane.b32.xlu1 %v2639_v28, %s2753_s29 }
 0x4a1   :  { %399 = vrot.lane.b32.xlu0 %v2641_v30, %s2753_s29 }
 0x512   :  { %v497_v31 = vpop.permute.xlu1 %496 }
 0x513   :  { %v499_v32 = vmul.f32 %v2635_v16, %v497_v31  ;;  %v400_v29 = vpop.permute.xlu0 %399 }
 0x514   :  { %v402_v33 = vmul.f32 %v2637_v18, %v400_v29 }
 0x515   :  { %501 = vrot.lane.b32.xlu0 %v499_v32, %s2754_s0 }
 0x516   :  { %505 = vrot.lane.b32.xlu1 %v402_v33, %s2755_s5 }
 0x587   :  { %v502_v34 = vpop.permute.xlu0 %501 }
 0x588   :  { %v506_v35 = vpop.permute.xlu1 %505  ;;  %2266 = vmatmul.mubr.msk.f32.vlgmr.msra.gmra.mrb[10].mxu0 %vm195_vm2, %v502_v34 }
 0x589   :  { %v508_v37 = vsel %vm195_vm2, %v502_v34, %v506_v35  ;;  %2503 = vmatpush3.bf16.msra.mxu0 %v2888_v36  ;;  %2284 = vmatprep.mubr.msk.f32.mxu0 %vm2751_vm1, %v2752_v4 }
 0x58a   :  { %2255 = vmatmul.mubr.msk.f32.vlgmr.msra.gmra.mrb[4].mxu1 %vm305_vm3, %v508_v37  ;;  %2504 = vmatprep.subr.bf16.mxu0 %v2750_v0 }
 0x58b   :  { %2515 = vmatpush3.bf16.msra.mxu1 %v2829_v8  ;;  %2295 = vmatprep.mubr.msk.f32.mxu1 %vm2751_vm1, %v2752_v4 }
 0x58c   :  { %2516 = vmatprep.subr.bf16.mxu1 %v2750_v0 }
 0x58d   :  { %2506 = vmatpush3.bf16.msra.mxu0 %v2899_v39 }
 0x58e   :  { %2507 = vmatprep.subr.bf16.mxu0 %v2750_v0 }
 0x58f   :  { %2518 = vmatpush3.bf16.msra.mxu1 %v2842_v12 }
 0x590   :  { %2519 = vmatprep.subr.bf16.mxu1 %v2750_v0 }
 0x591   :  { %2509 = vmatpush3.bf16.msra.mxu0 %v2917_v44 }
 0x592   :  { %2510 = vmatprep.subr.bf16.mxu0 %v2750_v0 }
 0x595   :  { %2512 = vmatpush3.bf16.msra.mxu0 %v2931_v48 }
 0x596   :  { %2531 = vmatprep.subr.bf16.mxu0 %v2750_v0 }
 0x65b   :  { %v674_v40 = vpop.f32.mrb[10].mxu0 }
 0x65c   :  { %v678_v41 = vadd.f32 %v674_v40, %v167_v38  ;;  %v2267_v42 = vpop.f32.mrb[11].mxu0 }
 0x65d   :  { %v578_v43 = vpop.f32.mrb[4].mxu1 }
 0x65e   :  { %2642 = vtanh.f32 %v678_v41  ;;  %v579_v45 = vadd.f32 %v2973_v60, %v578_v43  ;;  %v2256_v46 = vpop.f32.mrb[5].mxu1  ;;  %v2023_v50 = vmul.f32 -1.442695, %v678_v41 }
 0x660   :  { %2644 = vtanh.f32 %v579_v45  ;;  %v2021_v57 = vmul.f32 -1.442695, %v579_v45 }
 0x661   :  { %2646 = vpow2.f32 %v2023_v50 }
 0x662   :  { %2648 = vpow2.f32 %v2021_v57 }
 0x668   :  { %v2643_v47 = vpop.eup %2642 }
 0x669   :  { %688 = vrot.lane.b32.xlu1 %v2643_v47, %s2753_s29 }
 0x66a   :  { %v2645_v49 = vpop.eup %2644 }
 0x66b   :  { %591 = vrot.lane.b32.xlu0 %v2645_v49, %s2753_s29  ;;  %v2647_v52 = vpop.eup %2646 }
 0x66c   :  { %v2649_v58 = vpop.eup %2648  ;;  %v682_v59 = vadd.f32 1.0, %v2647_v52 }
 0x66d   :  { %v585_v61 = vadd.f32 1.0, %v2649_v58 }
 0x66e   :  { %2650 = vrcp.f32 %v682_v59 }
 0x66f   :  { %2652 = vrcp.f32 %v585_v61 }
 0x678   :  { %v2651_v62 = vpop.eup %2650 }
 0x679   :  { %v2653_v2 = vpop.eup %2652  ;;  %v686_v6 = vmul.f32 %v2651_v62, %v2981_v25 }
 0x67a   :  { %v589_v10 = vmul.f32 %v2653_v2, %v2983_v27 }
 0x6db   :  { %v689_v63 = vpop.permute.xlu1 %688 }
 0x6dc   :  { %v691_v1 = vmul.f32 %v2651_v62, %v689_v63 }
 0x6dd   :  { %v592_v3 = vpop.permute.xlu0 %591 }
 0x6de   :  { %693 = vrot.lane.b32.xlu1 %v691_v1, %s2753_s29  ;;  %v594_v5 = vmul.f32 %v2653_v2, %v592_v3 }
 0x6e0   :  { %596 = vrot.lane.b32.xlu0 %v594_v5, %s2753_s29 }
 0x750   :  { %v694_v7 = vpop.permute.xlu1 %693 }
 0x751   :  { %v3018_v9 = vadd.f32 %v694_v7, %v686_v6  ;;  %v177_v7 = vadd.f32 %v2859_v13, %v2943_v54 }
 0x752   :  { %v597_v11 = vpop.permute.xlu0 %596 }
 0x753   :  { %2654 = vtanh.f32 %v3018_v9  ;;  %v3022_v14 = vadd.f32 %v597_v11, %v589_v10 }
 0x755   :  { %2656 = vtanh.f32 %v3022_v14 }
 0x75d   :  { %v2655_v15 = vpop.eup %2654 }
 0x75e   :  { %699 = vrot.lane.b32.xlu1 %v2655_v15, %s2753_s29 }
 0x75f   :  { %v2657_v16 = vpop.eup %2656 }
 0x760   :  { %602 = vrot.lane.b32.xlu0 %v2657_v16, %s2753_s29 }
 0x7d0   :  { %v700_v17 = vpop.permute.xlu1 %699 }
 0x7d1   :  { %v702_v18 = vmul.f32 %v2651_v62, %v700_v17 }
 0x7d2   :  { %v603_v19 = vpop.permute.xlu0 %602 }
 0x7d3   :  { %704 = vrot.lane.b32.xlu0 %v702_v18, %s2754_s0  ;;  %v605_v20 = vmul.f32 %v2653_v2, %v603_v19 }
 0x7d5   :  { %708 = vrot.lane.b32.xlu1 %v605_v20, %s2755_s5 }
 0x845   :  { %v705_v21 = vpop.permute.xlu0 %704 }
 0x846   :  { %2296 = vmatmul.mubr.msk.f32.vlgmr.msra.gmra.mrb[6].mxu1 %vm195_vm2, %v705_v21 }
 0x847   :  { %2521 = vmatpush3.bf16.msra.mxu1 %v2888_v36  ;;  %2314 = vmatprep.mubr.msk.f32.mxu1 %vm2751_vm1, %v2752_v4  ;;  %v709_v22 = vpop.permute.xlu1 %708 }
 0x848   :  { %2522 = vmatprep.subr.bf16.mxu1 %v2750_v0  ;;  %v711_v23 = vsel %vm195_vm2, %v705_v21, %v709_v22 }
 0x849   :  { %2285 = vmatmul.mubr.msk.f32.vlgmr.msra.gmra.mrb[12].mxu0 %vm305_vm3, %v711_v23 }
 0x84a   :  { %2533 = vmatpush3.bf16.msra.mxu0 %v2829_v8  ;;  %2325 = vmatprep.mubr.msk.f32.mxu0 %vm2751_vm1, %v2752_v4 }
 0x84b   :  { %2524 = vmatpush3.bf16.msra.mxu1 %v2899_v39  ;;  %2534 = vmatprep.subr.bf16.mxu0 %v2750_v0 }
 0x84c   :  { %2525 = vmatprep.subr.bf16.mxu1 %v2750_v0 }
 0x84e   :  { %2536 = vmatpush3.bf16.msra.mxu0 %v2842_v12 }
 0x84f   :  { %2527 = vmatpush3.bf16.msra.mxu1 %v2917_v44  ;;  %2537 = vmatprep.subr.bf16.mxu0 %v2750_v0 }
 0x850   :  { %2528 = vmatprep.subr.bf16.mxu1 %v2750_v0 }
 0x853   :  { %2530 = vmatpush3.bf16.msra.mxu1 %v2931_v48 }
 0x854   :  { %2549 = vmatprep.subr.bf16.mxu1 %v2750_v0 }
 0x919   :  { %v877_v25 = vpop.f32.mrb[6].mxu1 }
 0x91a   :  { %v881_v26 = vadd.f32 %v877_v25, %v172_v24  ;;  %v2297_v27 = vpop.f32.mrb[7].mxu1 }
 0x91c   :  { %2658 = vtanh.f32 %v881_v26  ;;  %v781_v28 = vpop.f32.mrb[12].mxu0  ;;  %v2027_v33 = vmul.f32 -1.442695, %v881_v26 }
 0x91d   :  { %v782_v30 = vadd.f32 %v2973_v60, %v781_v28  ;;  %v2286_v31 = vpop.f32.mrb[13].mxu0 }
 0x91f   :  { %2660 = vtanh.f32 %v782_v30  ;;  %v2025_v34 = vmul.f32 -1.442695, %v782_v30 }
 0x920   :  { %2662 = vpow2.f32 %v2027_v33 }
 0x921   :  { %2664 = vpow2.f32 %v2025_v34 }
 0x926   :  { %v2659_v32 = vpop.eup %2658 }
 0x927   :  { %891 = vrot.lane.b32.xlu1 %v2659_v32, %s2753_s29 }
 0x929   :  { %v2661_v29 = vpop.eup %2660 }
 0x92a   :  { %794 = vrot.lane.b32.xlu0 %v2661_v29, %s2753_s29  ;;  %v2663_v51 = vpop.eup %2662 }
 0x92b   :  { %v885_v35 = vadd.f32 1.0, %v2663_v51  ;;  %v2665_v37 = vpop.eup %2664 }
 0x92c   :  { %v788_v38 = vadd.f32 1.0, %v2665_v37 }
 0x92d   :  { %2666 = vrcp.f32 %v885_v35 }
 0x92e   :  { %2668 = vrcp.f32 %v788_v38 }
 0x937   :  { %v2667_v40 = vpop.eup %2666 }
 0x938   :  { %v2669_v43 = vpop.eup %2668  ;;  %v889_v47 = vmul.f32 %v2667_v40, %v3018_v9 }
 0x939   :  { %v792_v57 = vmul.f32 %v2669_v43, %v3022_v14 }
 0x999   :  { %v892_v41 = vpop.permute.xlu1 %891 }
 0x99a   :  { %v894_v42 = vmul.f32 %v2667_v40, %v892_v41 }
 0x99c   :  { %896 = vrot.lane.b32.xlu1 %v894_v42, %s2753_s29  ;;  %v795_v45 = vpop.permute.xlu0 %794 }
 0x99d   :  { %v797_v46 = vmul.f32 %v2669_v43, %v795_v45 }
 0x99f   :  { %799 = vrot.lane.b32.xlu0 %v797_v46, %s2753_s29 }
 0xa0e   :  { %v897_v49 = vpop.permute.xlu1 %896 }
 0xa0f   :  { %v3056_v50 = vadd.f32 %v897_v49, %v889_v47  ;;  %v182_v47 = vadd.f32 %v2941_v53, %v2859_v13 }
 0xa11   :  { %2670 = vtanh.f32 %v3056_v50  ;;  %v800_v52 = vpop.permute.xlu0 %799 }
 0xa12   :  { %v3060_v58 = vadd.f32 %v800_v52, %v792_v57 }
 0xa14   :  { %2672 = vtanh.f32 %v3060_v58 }
 0xa1b   :  { %v2671_v59 = vpop.eup %2670 }
 0xa1c   :  { %902 = vrot.lane.b32.xlu1 %v2671_v59, %s2753_s29 }
 0xa1e   :  { %v2673_v61 = vpop.eup %2672 }
 0xa1f   :  { %805 = vrot.lane.b32.xlu0 %v2673_v61, %s2753_s29 }
 0xa8e   :  { %v903_v62 = vpop.permute.xlu1 %902 }
 0xa8f   :  { %v905_v63 = vmul.f32 %v2667_v40, %v903_v62 }
 0xa91   :  { %907 = vrot.lane.b32.xlu0 %v905_v63, %s2754_s0  ;;  %v806_v1 = vpop.permute.xlu0 %805 }
 0xa92   :  { %v808_v2 = vmul.f32 %v2669_v43, %v806_v1 }
 0xa94   :  { %911 = vrot.lane.b32.xlu1 %v808_v2, %s2755_s5 }
 0xb03   :  { %v908_v3 = vpop.permute.xlu0 %907 }
 0xb04   :  { %2326 = vmatmul.mubr.msk.f32.vlgmr.msra.gmra.mrb[14].mxu0 %vm195_vm2, %v908_v3 }
 0xb05   :  { %2539 = vmatpush3.bf16.msra.mxu0 %v2888_v36  ;;  %2344 = vmatprep.mubr.msk.f32.mxu0 %vm2751_vm1, %v2752_v4 }
 0xb06   :  { %2540 = vmatprep.subr.bf16.mxu0 %v2750_v0  ;;  %v912_v5 = vpop.permute.xlu1 %911 }
 0xb07   :  { %v914_v6 = vsel %vm195_vm2, %v908_v3, %v912_v5 }
 0xb08   :  { %2315 = vmatmul.mubr.msk.f32.vlgmr.msra.gmra.mrb[8].mxu1 %vm305_vm3, %v914_v6 }
 0xb09   :  { %2542 = vmatpush3.bf16.msra.mxu0 %v2899_v39  ;;  %2551 = vmatpush3.bf16.msra.mxu1 %v2829_v8 }
 0xb0a   :  { %2543 = vmatprep.subr.bf16.mxu0 %v2750_v0  ;;  %2552 = vmatprep.subr.bf16.mxu1 %v2750_v0 }
 0xb0b   :  { %2355 = vmatprep.mubr.msk.f32.mxu1 %vm2751_vm1, %v2752_v4 }
 0xb0d   :  { %2545 = vmatpush3.bf16.msra.mxu0 %v2917_v44  ;;  %2554 = vmatpush3.bf16.msra.mxu1 %v2842_v12 }
 0xb0e   :  { %2546 = vmatprep.subr.bf16.mxu0 %v2750_v0  ;;  %2555 = vmatprep.subr.bf16.mxu1 %v2750_v0 }
 0xb11   :  { %2548 = vmatpush3.bf16.msra.mxu0 %v2931_v48 }
 0xb12   :  { %2567 = vmatprep.subr.bf16.mxu0 %v2750_v0 }
 0xbd7   :  { %v1080_v9 = vpop.f32.mrb[14].mxu0 }
 0xbd8   :  { %v1084_v10 = vadd.f32 %v1080_v9, %v177_v7  ;;  %v2327_v11 = vpop.f32.mrb[15].mxu0 }
 0xbda   :  { %2674 = vtanh.f32 %v1084_v10  ;;  %v2031_v19 = vmul.f32 -1.442695, %v1084_v10 }
 0xbdb   :  { %v984_v14 = vpop.f32.mrb[8].mxu1 }
 0xbdc   :  { %v985_v15 = vadd.f32 %v2973_v60, %v984_v14  ;;  %v2316_v16 = vpop.f32.mrb[9].mxu1 }
 0xbde   :  { %2676 = vtanh.f32 %v985_v15  ;;  %v2029_v20 = vmul.f32 -1.442695, %v985_v15 }
 0xbdf   :  { %2678 = vpow2.f32 %v2031_v19 }
 0xbe0   :  { %2680 = vpow2.f32 %v2029_v20 }
 0xbe4   :  { %v2675_v17 = vpop.eup %2674 }
 0xbe5   :  { %1094 = vrot.lane.b32.xlu1 %v2675_v17, %s2753_s29 }
 0xbe8   :  { %v2677_v18 = vpop.eup %2676 }
 0xbe9   :  { %997 = vrot.lane.b32.xlu0 %v2677_v18, %s2753_s29  ;;  %v2679_v54 = vpop.eup %2678 }
 0xbea   :  { %v1088_v21 = vadd.f32 1.0, %v2679_v54  ;;  %v2681_v22 = vpop.eup %2680 }
 0xbeb   :  { %v991_v23 = vadd.f32 1.0, %v2681_v22 }
 0xbec   :  { %2682 = vrcp.f32 %v1088_v21 }
 0xbed   :  { %2684 = vrcp.f32 %v991_v23 }
 0xbf6   :  { %v2683_v24 = vpop.eup %2682 }
 0xbf7   :  { %v2685_v27 = vpop.eup %2684  ;;  %v1092_v31 = vmul.f32 %v2683_v24, %v3056_v50 }
 0xbf8   :  { %v995_v33 = vmul.f32 %v2685_v27, %v3060_v58 }
 0xc57   :  { %v1095_v25 = vpop.permute.xlu1 %1094 }
 0xc58   :  { %v1097_v26 = vmul.f32 %v2683_v24, %v1095_v25 }
 0xc5a   :  { %1099 = vrot.lane.b32.xlu1 %v1097_v26, %s2753_s29 }
 0xc5b   :  { %v998_v28 = vpop.permute.xlu0 %997 }
 0xc5c   :  { %v1000_v30 = vmul.f32 %v2685_v27, %v998_v28 }
 0xc5e   :  { %1002 = vrot.lane.b32.xlu0 %v1000_v30, %s2753_s29 }
 0xccc   :  { %v1100_v32 = vpop.permute.xlu1 %1099 }
 0xccd   :  { %v3094_v29 = vadd.f32 %v1100_v32, %v1092_v31 }
 0xccf   :  { %2686 = vtanh.f32 %v3094_v29 }
 0xcd0   :  { %v1003_v34 = vpop.permute.xlu0 %1002 }
 0xcd1   :  { %v3098_v51 = vadd.f32 %v1003_v34, %v995_v33 }
 0xcd3   :  { %2688 = vtanh.f32 %v3098_v51 }
 0xcd9   :  { %v2687_v35 = vpop.eup %2686 }
 0xcda   :  { %1105 = vrot.lane.b32.xlu1 %v2687_v35, %s2753_s29 }
 0xcdd   :  { %v2689_v37 = vpop.eup %2688 }
 0xcde   :  { %1008 = vrot.lane.b32.xlu0 %v2689_v37, %s2753_s29 }
 0xd4c   :  { %v1106_v38 = vpop.permute.xlu1 %1105 }
 0xd4d   :  { %v1108_v40 = vmul.f32 %v2683_v24, %v1106_v38 }
 0xd4f   :  { %1110 = vrot.lane.b32.xlu0 %v1108_v40, %s2754_s0 }
 0xd50   :  { %v1009_v41 = vpop.permute.xlu0 %1008 }
 0xd51   :  { %v1011_v42 = vmul.f32 %v2685_v27, %v1009_v41 }
 0xd53   :  { %1114 = vrot.lane.b32.xlu1 %v1011_v42, %s2755_s5 }
 0xdc1   :  { %v1111_v43 = vpop.permute.xlu0 %1110 }
 0xdc2   :  { %2356 = vmatmul.mubr.msk.f32.vlgmr.msra.gmra.mrb[10].mxu1 %vm195_vm2, %v1111_v43 }
 0xdc3   :  { %2557 = vmatpush3.bf16.msra.mxu1 %v2888_v36  ;;  %2374 = vmatprep.mubr.msk.f32.mxu1 %vm2751_vm1, %v2752_v4 }
 0xdc4   :  { %2558 = vmatprep.subr.bf16.mxu1 %v2750_v0 }
 0xdc5   :  { %v1115_v45 = vpop.permute.xlu1 %1114 }
 0xdc6   :  { %v1117_v46 = vsel %vm195_vm2, %v1111_v43, %v1115_v45 }
 0xdc7   :  { %2560 = vmatpush3.bf16.msra.mxu1 %v2899_v39  ;;  %2345 = vmatmul.mubr.msk.f32.vlgmr.msra.gmra.mrb[16].mxu0 %vm305_vm3, %v1117_v46 }
 0xdc8   :  { %2561 = vmatprep.subr.bf16.mxu1 %v2750_v0  ;;  %2569 = vmatpush3.bf16.msra.mxu0 %v2829_v8 }
 0xdc9   :  { %2385 = vmatprep.mubr.msk.f32.mxu0 %vm2751_vm1, %v2752_v4  ;;  %2570 = vmatprep.subr.bf16.mxu0 %v2750_v0 }
 0xdcb   :  { %2563 = vmatpush3.bf16.msra.mxu1 %v2917_v44 }
 0xdcc   :  { %2564 = vmatprep.subr.bf16.mxu1 %v2750_v0  ;;  %2572 = vmatpush3.bf16.msra.mxu0 %v2842_v12 }
 0xdcd   :  { %2573 = vmatprep.subr.bf16.mxu0 %v2750_v0 }
 0xdcf   :  { %2566 = vmatpush3.bf16.msra.mxu1 %v2931_v48 }
 0xdd0   :  { %2585 = vmatprep.subr.bf16.mxu1 %v2750_v0 }
 0xe95   :  { %v1283_v49 = vpop.f32.mrb[10].mxu1 }
 0xe96   :  { %v1287_v50 = vadd.f32 %v1283_v49, %v182_v47  ;;  %v2357_v57 = vpop.f32.mrb[11].mxu1 }
 0xe98   :  { %2690 = vtanh.f32 %v1287_v50  ;;  %v2035_v63 = vmul.f32 -1.442695, %v1287_v50 }
 0xe9a   :  { %v1187_v52 = vpop.f32.mrb[16].mxu0 }
 0xe9b   :  { %v1188_v58 = vadd.f32 %v2973_v60, %v1187_v52  ;;  %v2346_v59 = vpop.f32.mrb[17].mxu0 }
 0xe9d   :  { %2692 = vtanh.f32 %v1188_v58  ;;  %v2033_v1 = vmul.f32 -1.442695, %v1188_v58 }
 0xe9e   :  { %2694 = vpow2.f32 %v2035_v63 }
 0xe9f   :  { %2696 = vpow2.f32 %v2033_v1 }
 0xea2   :  { %v2691_v61 = vpop.eup %2690 }
 0xea3   :  { %1297 = vrot.lane.b32.xlu1 %v2691_v61, %s2753_s29 }
 0xea7   :  { %v2693_v62 = vpop.eup %2692 }
 0xea8   :  { %1200 = vrot.lane.b32.xlu0 %v2693_v62, %s2753_s29  ;;  %v2695_v53 = vpop.eup %2694 }
 0xea9   :  { %v1291_v2 = vadd.f32 1.0, %v2695_v53  ;;  %v2697_v3 = vpop.eup %2696 }
 0xeaa   :  { %v1194_v5 = vadd.f32 1.0, %v2697_v3 }
 0xeab   :  { %2698 = vrcp.f32 %v1291_v2 }
 0xeac   :  { %2700 = vrcp.f32 %v1194_v5 }
 0xeb5   :  { %v2699_v6 = vpop.eup %2698 }
 0xeb6   :  { %v2701_v10 = vpop.eup %2700  ;;  %v1295_v15 = vmul.f32 %v2699_v6, %v3094_v29 }
 0xeb7   :  { %v1198_v18 = vmul.f32 %v2701_v10, %v3098_v51 }
 0xf15   :  { %v1298_v7 = vpop.permute.xlu1 %1297 }
 0xf16   :  { %v1300_v9 = vmul.f32 %v2699_v6, %v1298_v7 }
 0xf18   :  { %1302 = vrot.lane.b32.xlu1 %v1300_v9, %s2753_s29 }
 0xf1a   :  { %v1201_v11 = vpop.permute.xlu0 %1200 }
 0xf1b   :  { %v1203_v14 = vmul.f32 %v2701_v10, %v1201_v11 }
 0xf1d   :  { %1205 = vrot.lane.b32.xlu0 %v1203_v14, %s2753_s29 }
 0xf8a   :  { %v1303_v16 = vpop.permute.xlu1 %1302 }
 0xf8b   :  { %v3132_v17 = vadd.f32 %v1303_v16, %v1295_v15 }
 0xf8d   :  { %2702 = vtanh.f32 %v3132_v17 }
 0xf8f   :  { %v1206_v19 = vpop.permute.xlu0 %1205 }
 0xf90   :  { %v3136_v20 = vadd.f32 %v1206_v19, %v1198_v18 }
 0xf92   :  { %2704 = vtanh.f32 %v3136_v20 }
 0xf97   :  { %v2703_v54 = vpop.eup %2702 }
 0xf98   :  { %1308 = vrot.lane.b32.xlu1 %v2703_v54, %s2753_s29 }
 0xf9c   :  { %v2705_v21 = vpop.eup %2704 }
 0xf9d   :  { %1211 = vrot.lane.b32.xlu0 %v2705_v21, %s2753_s29 }
0x100a   :  { %v1309_v22 = vpop.permute.xlu1 %1308 }
0x100b   :  { %v1311_v23 = vmul.f32 %v2699_v6, %v1309_v22 }
0x100d   :  { %1313 = vrot.lane.b32.xlu0 %v1311_v23, %s2754_s0 }
0x100f   :  { %v1212_v24 = vpop.permute.xlu0 %1211 }
0x1010   :  { %v1214_v25 = vmul.f32 %v2701_v10, %v1212_v24 }
0x1012   :  { %1317 = vrot.lane.b32.xlu1 %v1214_v25, %s2755_s5 }
0x107f   :  { %v1314_v26 = vpop.permute.xlu0 %1313 }
0x1080   :  { %2386 = vmatmul.mubr.msk.f32.vlgmr.msra.gmra.mrb[18].mxu0 %vm195_vm2, %v1314_v26 }
0x1081   :  { %2575 = vmatpush3.bf16.msra.mxu0 %v2888_v36  ;;  %2404 = vmatprep.mubr.msk.f32.mxu0 %vm2751_vm1, %v2752_v4 }
0x1082   :  { %2576 = vmatprep.subr.bf16.mxu0 %v2750_v0 }
0x1084   :  { %v1318_v27 = vpop.permute.xlu1 %1317 }
0x1085   :  { %2578 = vmatpush3.bf16.msra.mxu0 %v2899_v39  ;;  %v1320_v28 = vsel %vm195_vm2, %v1314_v26, %v1318_v27 }
0x1086   :  { %2579 = vmatprep.subr.bf16.mxu0 %v2750_v0  ;;  %2375 = vmatmul.mubr.msk.f32.vlgmr.msra.gmra.mrb[12].mxu1 %vm305_vm3, %v1320_v28 }
0x1087   :  { %2587 = vmatpush3.bf16.msra.mxu1 %v2829_v8  ;;  %2415 = vmatprep.mubr.msk.f32.mxu1 %vm2751_vm1, %v2752_v4  ;;  %v187_v8 = vadd.f32 %v2859_v13, %v2947_v56 }
0x1088   :  { %2588 = vmatprep.subr.bf16.mxu1 %v2750_v0 }
0x1089   :  { %2581 = vmatpush3.bf16.msra.mxu0 %v2917_v44 }
0x108a   :  { %2582 = vmatprep.subr.bf16.mxu0 %v2750_v0 }
0x108b   :  { %2590 = vmatpush3.bf16.msra.mxu1 %v2842_v12 }
0x108c   :  { %2591 = vmatprep.subr.bf16.mxu1 %v2750_v0 }
0x108d   :  { %2584 = vmatpush3.bf16.msra.mxu0 %v2931_v48 }
0x108e   :  { %2603 = vmatprep.subr.bf16.mxu0 %v2750_v0 }
0x1153   :  { %v1486_v30 = vpop.f32.mrb[18].mxu0 }
0x1154   :  { %v1490_v31 = vadd.f32 %v1486_v30, %v187_v8  ;;  %v2387_v32 = vpop.f32.mrb[19].mxu0 }
0x1156   :  { %2706 = vtanh.f32 %v1490_v31  ;;  %v2039_v35 = vmul.f32 -1.442695, %v1490_v31 }
0x1159   :  { %v1390_v29 = vpop.f32.mrb[12].mxu1 }
0x115a   :  { %v1391_v33 = vadd.f32 %v2973_v60, %v1390_v29  ;;  %v2376_v34 = vpop.f32.mrb[13].mxu1 }
0x115c   :  { %2708 = vtanh.f32 %v1391_v33  ;;  %v2037_v37 = vmul.f32 -1.442695, %v1391_v33 }
0x115d   :  { %2710 = vpow2.f32 %v2039_v35 }
0x115e   :  { %2712 = vpow2.f32 %v2037_v37 }
0x1160   :  { %v2707_v51 = vpop.eup %2706 }
0x1161   :  { %1500 = vrot.lane.b32.xlu1 %v2707_v51, %s2753_s29 }
0x1166   :  { %v2709_v12 = vpop.eup %2708 }
0x1167   :  { %1403 = vrot.lane.b32.xlu0 %v2709_v12, %s2753_s29  ;;  %v2711_v56 = vpop.eup %2710 }
0x1168   :  { %v1494_v38 = vadd.f32 1.0, %v2711_v56  ;;  %v2713_v40 = vpop.eup %2712 }
0x1169   :  { %v1397_v41 = vadd.f32 1.0, %v2713_v40 }
0x116a   :  { %2714 = vrcp.f32 %v1494_v38 }
0x116b   :  { %2716 = vrcp.f32 %v1397_v41 }
0x1174   :  { %v2715_v42 = vpop.eup %2714 }
0x1175   :  { %v2717_v46 = vpop.eup %2716  ;;  %v1498_v50 = vmul.f32 %v2715_v42, %v3132_v17 }
0x1176   :  { %v1401_v58 = vmul.f32 %v2717_v46, %v3136_v20 }
0x11d3   :  { %v1501_v43 = vpop.permute.xlu1 %1500 }
0x11d4   :  { %v1503_v45 = vmul.f32 %v2715_v42, %v1501_v43 }
0x11d6   :  { %1505 = vrot.lane.b32.xlu1 %v1503_v45, %s2753_s29 }
0x11d9   :  { %v1404_v47 = vpop.permute.xlu0 %1403 }
0x11da   :  { %v1406_v49 = vmul.f32 %v2717_v46, %v1404_v47 }
0x11dc   :  { %1408 = vrot.lane.b32.xlu0 %v1406_v49, %s2753_s29 }
0x1248   :  { %v1506_v57 = vpop.permute.xlu1 %1505 }
0x1249   :  { %v1508_v52 = vadd.f32 %v1506_v57, %v1498_v50 }
0x124b   :  { %2718 = vtanh.f32 %v1508_v52 }
0x124e   :  { %v1409_v59 = vpop.permute.xlu0 %1408 }
0x124f   :  { %v1411_v61 = vadd.f32 %v1409_v59, %v1401_v58  ;;  %v1825_v58 = vld [vmem:[%s3246_s6 + $0x8] sm:$0xff]  ;;  %v1826_v59 = vld [vmem:[%s3246_s6 + $0x10] sm:$0xff] }
0x1251   :  { %2720 = vtanh.f32 %v1411_v61 }
0x1255   :  { %v2719_v62 = vpop.eup %2718 }
0x1256   :  { %1511 = vrot.lane.b32.xlu1 %v2719_v62, %s2753_s29  ;;  %v1827_v62 = vld [vmem:[%s3246_s6 + $0x18] sm:$0xff] }
0x125b   :  { %v2721_v63 = vpop.eup %2720 }
0x125c   :  { %1414 = vrot.lane.b32.xlu0 %v2721_v63, %s2753_s29  ;;  %v2607_v63 = vpack.c.bf16 %v1827_v62, %v1826_v59 }
0x12c8   :  { %v1512_v1 = vpop.permute.xlu1 %1511 }
0x12c9   :  { %v1514_v53 = vmul.f32 %v2715_v42, %v1512_v1 }
0x12cb   :  { %1516 = vrot.lane.b32.xlu0 %v1514_v53, %s2754_s0 }
0x12ce   :  { %v1415_v2 = vpop.permute.xlu0 %1414 }
0x12cf   :  { %v1417_v3 = vmul.f32 %v2717_v46, %v1415_v2 }
0x12d1   :  { %1520 = vrot.lane.b32.xlu1 %v1417_v3, %s2755_s5 }
0x133d   :  { %v1517_v5 = vpop.permute.xlu0 %1516 }
0x133e   :  { %2416 = vmatmul.mubr.msk.f32.vlgmr.msra.gmra.mrb[14].mxu1 %vm195_vm2, %v1517_v5 }
0x133f   :  { %2593 = vmatpush3.bf16.msra.mxu1 %v2888_v36  ;;  %2434 = vmatprep.mubr.msk.f32.mxu1 %vm2751_vm1, %v2752_v4  ;;  %v192_v36 = vadd.f32 %v2945_v55, %v2859_v13 }
0x1340   :  { %2594 = vmatprep.subr.bf16.mxu1 %v2750_v0 }
0x1343   :  { %2596 = vmatpush3.bf16.msra.mxu1 %v2899_v39  ;;  %v1521_v6 = vpop.permute.xlu1 %1520 }
0x1344   :  { %2597 = vmatprep.subr.bf16.mxu1 %v2750_v0  ;;  %v1523_v7 = vsel %vm195_vm2, %v1517_v5, %v1521_v6  ;;  %v1911_v5 = vld [vmem:[%s3247_s8] sm:$0xff] }
0x1345   :  { %2405 = vmatmul.mubr.msk.f32.vlgmr.msra.gmra.mrb[20].mxu0 %vm305_vm3, %v1523_v7  ;;  %v2046_v7 = vld [vmem:[%s3248_s7] ss:$0 sm:$0xff] }
0x1346   :  { %2445 = vmatprep.mubr.msk.f32.mxu0 %vm2751_vm1, %v2752_v4 }
0x1347   :  { %2599 = vmatpush3.bf16.msra.mxu1 %v2917_v44 }
0x1348   :  { %2600 = vmatprep.subr.bf16.mxu1 %v2750_v0 }
0x134b   :  { %2602 = vmatpush3.bf16.msra.mxu1 %v2931_v48 }
0x1411   :  { %v1689_v39 = vpop.f32.mrb[14].mxu1 }
0x1412   :  { %v1693_v9 = vadd.f32 %v1689_v39, %v192_v36  ;;  %v2417_v10 = vpop.f32.mrb[15].mxu1 }
0x1414   :  { %2722 = vtanh.f32 %v1693_v9  ;;  %v2043_v17 = vmul.f32 -1.442695, %v1693_v9 }
0x1418   :  { %v1593_v11 = vpop.f32.mrb[20].mxu0 }
0x1419   :  { %v1594_v14 = vadd.f32 %v2973_v60, %v1593_v11  ;;  %v2406_v15 = vpop.f32.mrb[21].mxu0 }
0x141b   :  { %2724 = vtanh.f32 %v1594_v14  ;;  %v2041_v48 = vmul.f32 -1.442695, %v1594_v14 }
0x141c   :  { %2726 = vpow2.f32 %v2043_v17 }
0x141d   :  { %2728 = vpow2.f32 %v2041_v48 }
0x141e   :  { %v2723_v44 = vpop.eup %2722 }
0x141f   :  { %1703 = vrot.lane.b32.xlu1 %v2723_v44, %s2753_s29 }
0x1425   :  { %v2725_v16 = vpop.eup %2724 }
0x1426   :  { %1606 = vrot.lane.b32.xlu0 %v2725_v16, %s2753_s29  ;;  %v2727_v13 = vpop.eup %2726 }
0x1427   :  { %v1697_v55 = vadd.f32 1.0, %v2727_v13  ;;  %v2729_v18 = vpop.eup %2728 }
0x1428   :  { %v1600_v19 = vadd.f32 1.0, %v2729_v18 }
0x1429   :  { %2730 = vrcp.f32 %v1697_v55 }
0x142a   :  { %2732 = vrcp.f32 %v1600_v19 }
0x1433   :  { %v2731_v20 = vpop.eup %2730 }
0x1434   :  { %v2733_v22 = vpop.eup %2732  ;;  %v1701_v25 = vmul.f32 %v2731_v20, %v1508_v52 }
0x1435   :  { %v1604_v28 = vmul.f32 %v2733_v22, %v1411_v61 }
0x1491   :  { %v1704_v54 = vpop.permute.xlu1 %1703 }
0x1492   :  { %v1706_v21 = vmul.f32 %v2731_v20, %v1704_v54 }
0x1494   :  { %1708 = vrot.lane.b32.xlu1 %v1706_v21, %s2753_s29 }
0x1498   :  { %v1607_v23 = vpop.permute.xlu0 %1606 }
0x1499   :  { %v1609_v24 = vmul.f32 %v2733_v22, %v1607_v23 }
0x149b   :  { %1611 = vrot.lane.b32.xlu0 %v1609_v24, %s2753_s29 }
0x1506   :  { %v1709_v26 = vpop.permute.xlu1 %1708 }
0x1507   :  { %v1711_v27 = vadd.f32 %v1709_v26, %v1701_v25 }
0x1509   :  { %2734 = vtanh.f32 %v1711_v27 }
0x150d   :  { %v1612_v8 = vpop.permute.xlu0 %1611 }
0x150e   :  { %v1614_v30 = vadd.f32 %v1612_v8, %v1604_v28 }
0x1510   :  { %2736 = vtanh.f32 %v1614_v30 }
0x1513   :  { %v2735_v31 = vpop.eup %2734 }
0x1514   :  { %1714 = vrot.lane.b32.xlu1 %v2735_v31, %s2753_s29 }
0x151a   :  { %v2737_v32 = vpop.eup %2736 }
0x151b   :  { %1617 = vrot.lane.b32.xlu0 %v2737_v32, %s2753_s29 }
0x1586   :  { %v1715_v29 = vpop.permute.xlu1 %1714 }
0x1587   :  { %v1717_v33 = vmul.f32 %v2731_v20, %v1715_v29 }
0x1589   :  { %1719 = vrot.lane.b32.xlu0 %v1717_v33, %s2754_s0 }
0x158d   :  { %v1618_v34 = vpop.permute.xlu0 %1617 }
0x158e   :  { %v1620_v51 = vmul.f32 %v2733_v22, %v1618_v34 }
0x1590   :  { %1723 = vrot.lane.b32.xlu1 %v1620_v51, %s2755_s5 }
0x15fb   :  { %v1720_v12 = vpop.permute.xlu0 %1719 }
0x1602   :  { %v1724_v35 = vpop.permute.xlu1 %1723 }
0x1603   :  { %v1726_v37 = vsel %vm195_vm2, %v1720_v12, %v1724_v35 }
0x1604   :  { %2435 = vmatmul.mubr.msk.f32.vlgmr.msra.gmra.mrb[16].mxu1 %vm305_vm3, %v1726_v37 }
0x16d7   :  { %v1796_v56 = vpop.f32.mrb[16].mxu1 }
0x16d8   :  { %v1797_v38 = vadd.f32 %v2973_v60, %v1796_v56  ;;  %v2436_v40 = vpop.f32.mrb[17].mxu1  ;;  %v1824_v60 = vld [vmem:[%s3246_s6] sm:$0xff] }
0x16d9   :  { %v2604_v61 = vpack.c.bf16 %v1825_v58, %v1824_v60 }
0x16da   :  { %2738 = vtanh.f32 %v1797_v38  ;;  %v2045_v42 = vmul.f32 -1.442695, %v1797_v38 }
0x16db   :  { %2605 = vmatpush3.bf16.msra.mxu0 %v2604_v61 }
0x16dc   :  { %2740 = vpow2.f32 %v2045_v42  ;;  %2606 = vmatprep.subr.bf16.mxu0 %v2750_v0 }
0x16df   :  { %2608 = vmatpush3.bf16.msra.mxu0 %v2607_v63 }
0x16e0   :  { %2609 = vmatprep.subr.bf16.mxu0 %v2750_v0  ;;  %v1912_v0 = vld [vmem:[%s3247_s8 + $0x8] sm:$0xff] }
0x16e1   :  { %v2610_v6 = vpack.c.bf16 %v1912_v0, %v1911_v5 }
0x16e4   :  { %v2739_v41 = vpop.eup %2738 }
0x16e5   :  { %1809 = vrot.lane.b32.xlu0 %v2739_v41, %s2753_s29 }
0x16e6   :  { %v2741_v43 = vpop.eup %2740 }
0x16e7   :  { %v1803_v45 = vadd.f32 1.0, %v2741_v43 }
0x16e9   :  { %2742 = vrcp.f32 %v1803_v45 }
0x16f3   :  { %v2743_v46 = vpop.eup %2742 }
0x16f4   :  { %v1807_v50 = vmul.f32 %v2743_v46, %v1614_v30 }
0x1757   :  { %v1810_v47 = vpop.permute.xlu0 %1809 }
0x1758   :  { %v1812_v49 = vmul.f32 %v2743_v46, %v1810_v47 }
0x175a   :  { %1814 = vrot.lane.b32.xlu1 %v1812_v49, %s2753_s29 }
0x17cc   :  { %v1815_v57 = vpop.permute.xlu1 %1814 }
0x17cd   :  { %v1817_v52 = vadd.f32 %v1815_v57, %v1807_v50 }
0x17cf   :  { %2744 = vtanh.f32 %v1817_v52 }
0x17d9   :  { %v2745_v1 = vpop.eup %2744 }
0x17da   :  { %1820 = vrot.lane.b32.xlu0 %v2745_v1, %s2753_s29 }
0x184c   :  { %v1821_v53 = vpop.permute.xlu0 %1820 }
0x184d   :  { %v1823_v2 = vmul.f32 %v2743_v46, %v1821_v53 }
0x184f   :  { %1836 = vrot.lane.b32.xlu1 %v1823_v2, %s2754_s0 }
0x18c1   :  { %v1837_v3 = vpop.permute.xlu1 %1836 }
0x18c2   :  { %2446 = vmatmul.mubr.msk.f32.vlgmr.msra.gmra.mrb[22].mxu0 %vm195_vm2, %v1837_v3 }
0x18c3   :  { %2452 = vmatprep.mubr.msk.f32.mxu0 %vm2751_vm1, %v2752_v4  ;;  %2611 = vmatpush3.bf16.msra.mxu0 %v2610_v6  ;;  %v2048_v4 = vld [vmem:[%s3249_s9] ss:$0 sm:$0xff] }
0x1995   :  { %v1906_v36 = vpop.f32.mrb[22].mxu0 }
0x1996   :  { %v1907_v39 = vadd.f32 %v2046_v7, %v1906_v36  ;;  %v2447_v9 = vpop.f32.mrb[23].mxu0 }
0x1998   :  { %v1910_v10 = vmax.f32 %v1907_v39, 0.0 }
0x199a   :  { %2453 = vmatmul.mubr.msk.f32.vlgmr.msra.gmra.mrb[24].mxu0 %vm65_vm0, %v1910_v10 }
0x1a6d   :  { %v1989_v11 = vpop.f32.mrb[24].mxu0 }
0x1a6e   :  { %v1990_v14 = vadd.f32 %v2048_v4, %v1989_v11  ;;  %v2454_v15 = vpop.f32.mrb[25].mxu0 }
0x1a70   :  { %v2050_v44 = vmul.f32 -1.442695, %v1990_v14 }
0x1a72   :  { %2746 = vpow2.f32 %v2050_v44 }
0x1a7c   :  { %v2747_v16 = vpop.eup %2746 }
0x1a7d   :  { %v1996_v17 = vadd.f32 1.0, %v2747_v16 }
0x1a7f   :  { %2748 = vrcp.f32 %v1996_v17 }
0x1a89   :  { %v2749_v48 = vpop.eup %2748 }
0x1a8a   :  { %2000 = vst.msk [vmem:[%s3250_s10] sm:$0xff] %vm1999_vm4, %v2749_v48 }

</bundles_post_ra>
